<compile_context>
chip_gen: v6e
topology: v6e:2x2x1
jax: 0.10.0
libtpu: 0.0.40
codegen_flags: <defaults>
</compile_context>

<pallas_src>
import jax
import jax.numpy as jnp
from jax.experimental import pallas as pl
from jax.experimental.pallas import tpu as pltpu

B = 2
BP = 8                     # batch padded to one f32 sublane tile
L0 = 126                   # input length
L1, P1L = 124, 62          # after conv1 / pool1
L2, P2L = 60, 30           # after conv2 / pool2
C1, C2 = 16, 32
KW = 3                     # conv kernel width
F_IN, H1, H2 = C2 * P2L, 128, 64   # 960 -> 128 -> 64 -> 1


# ---------------------------------------------------------------------------
# Pallas kernel: conv1 -> relu -> pool1 -> conv2 -> relu -> (pool2∘fc1) ->
#                relu -> (fc2 ∘ classifier) -> sigmoid
# ---------------------------------------------------------------------------
def cnn_kernel(x_ref, w1_ref, b1_ref, p1_ref, w2_ref, b2_ref,
               fw_ref, fb1_ref, cw_ref, cb_ref, out_ref):
    # --- conv1 (1 -> 16, k=3) + ReLU on the VPU; channel-major (b, c, t), time on lanes.
    x = x_ref[...]                                              # (BP, 1, 126)
    h1 = (x[:, :, 0:L1] * w1_ref[0]
          + x[:, :, 1:L1 + 1] * w1_ref[1]
          + x[:, :, 2:L1 + 2] * w1_ref[2])                      # (BP, 16, 124)
    h1 = jnp.maximum(h1 + b1_ref[...], 0.0)

    # --- avgpool1 (k=2, s=2): fold batch into MXU rows -> one 2D (128,124)x(124,62) matmul.
    a1 = jnp.dot(h1.reshape(BP * C1, L1), p1_ref[...],
                 preferred_element_type=jnp.float32)            # (128, 62)
    a1 = a1.reshape(BP, C1, P1L)                                # (BP, 16, 62)

    # --- conv2 (16 -> 32, k=3) + ReLU: stack the 3 shifted tap slices along the channel
    #     (sublane) axis and contract all 48 input features in ONE batched matmul.
    a1cat = jnp.concatenate(
        [a1[:, :, k:k + L2] for k in range(KW)], axis=1)        # (BP, 48, 60)
    w2 = jnp.broadcast_to(w2_ref[...], (BP, C2, KW * C1))       # (BP, 32, 48)
    h2 = jnp.einsum('boc,bct->bot', w2, a1cat,
                    preferred_element_type=jnp.float32)         # (BP, 32, 60)
    h2 = jnp.maximum(h2 + b2_ref[...], 0.0)

    # --- (avgpool2 ∘ fc1): pool2 was absorbed into fw_ref on the host, so flatten h2 once
    #     (o-major, matching PyTorch view(-1, 32*30) after pooling), cast to bf16 once and
    #     run a single (8,1920)x(1920,128) MXU matmul.
    flat = h2.reshape(BP, C2 * L2).astype(jnp.bfloat16)         # (BP, 1920) bf16
    y = jnp.dot(flat, fw_ref[...],
                preferred_element_type=jnp.float32) + fb1_ref[...]   # (BP, 128)
    # TODO(synk): nn.Dropout(0.2) treated as inference-mode identity (no RNG mask).
    y = jnp.maximum(y, 0.0)

    # --- fc2 ∘ classifier fused (no nonlinearity between them in the reference forward):
    #     a 128-lane reduction on the VPU/XLU, then sigmoid.
    logit = jnp.sum(y * cw_ref[...], axis=-1, keepdims=True) + cb_ref[...]   # (BP, 1)
    out_ref[...] = jax.nn.sigmoid(logit)


# ---------------------------------------------------------------------------
# Parameter setup (plain JAX glue).
# ---------------------------------------------------------------------------
def _uniform(key, shape, fan_in):
    bound = 1.0 / jnp.sqrt(jnp.asarray(fan_in, jnp.float32))
    return jax.random.uniform(key, shape, jnp.float32, -bound, bound)


def avgpool_matrix(L):
    """AvgPool1d(k=2, s=2) along time as an (L, L//2) matrix of 0.5 entries."""
    t = jnp.arange(L)[:, None]
    p = jnp.arange(L // 2)[None, :]
    return jnp.where((t == 2 * p) | (t == 2 * p + 1), 0.5, 0.0).astype(jnp.float32)


def make_raw_params(key):
    """PyTorch-layout params for the layers actually used by forward()."""
    ks = jax.random.split(key, 10)
    conv1_w = _uniform(ks[0], (C1, 1, KW), 1 * KW)
    conv1_b = _uniform(ks[1], (C1,), 1 * KW)
    conv2_w = _uniform(ks[2], (C2, C1, KW), C1 * KW)
    conv2_b = _uniform(ks[3], (C2,), C1 * KW)
    fc1_w = _uniform(ks[4], (H1, F_IN), F_IN)
    fc1_b = _uniform(ks[5], (H1,), F_IN)
    fc2_w = _uniform(ks[6], (H2, H1), H1)
    fc2_b = _uniform(ks[7], (H2,), H1)
    cls_w = _uniform(ks[8], (1, H2), H2)
    cls_b = _uniform(ks[9], (1,), H2)
    return (conv1_w, conv1_b, conv2_w, conv2_b, fc1_w, fc1_b,
            fc2_w, fc2_b, cls_w, cls_b)


def pack_params(raw):
    """Kernel-layout params: transposes, pool matrices and the two host-side fusions."""
    (conv1_w, conv1_b, conv2_w, conv2_b, fc1_w, fc1_b,
     fc2_w, fc2_b, cls_w, cls_b) = raw

    w1 = jnp.transpose(conv1_w, (2, 0, 1))                      # (3, 16, 1): w1[k,c,0]
    b1 = conv1_b.reshape(C1, 1)                                 # (16, 1)
    p1 = avgpool_matrix(L1)                                     # (124, 62)
    # conv2 taps concatenated along channels: w2[o, k*16+c] = conv2_w[o, c, k].
    w2 = jnp.transpose(conv2_w, (0, 2, 1)).reshape(C2, KW * C1)  # (32, 48)
    b2 = conv2_b.reshape(C2, 1)                                 # (32, 1)
    # avgpool2 absorbed into fc1: fw[o*60+t, h] = 0.5 * fc1_w[h, o*30 + t//2].
    fw = 0.5 * jnp.repeat(fc1_w.reshape(H1, C2, P2L), 2, axis=2)  # (128, 32, 60)
    fw = jnp.transpose(fw, (1, 2, 0)).reshape(C2 * L2, H1).astype(jnp.bfloat16)  # (1920,128)
    fb1 = fc1_b.reshape(1, H1)                                  # (1, 128)
    # fc2 ∘ classifier fused (forward has no nonlinearity between them).
    cw = (cls_w @ fc2_w).reshape(1, H1)                         # (1, 128)
    cb = (fc2_b @ cls_w.T + cls_b).reshape(1, 1)                # (1, 1)
    return (w1, b1, p1, w2, b2, fw, fb1, cw, cb)


def cnn_forward(x, params):
    n = x.shape[0]
    xp = jnp.zeros((BP, 1, L0), jnp.float32).at[:n, 0, :].set(x)
    vmem = pl.BlockSpec(memory_space=pltpu.MemorySpace.VMEM)
    out = pl.pallas_call(
        cnn_kernel,
        out_shape=jax.ShapeDtypeStruct((BP, 1), jnp.float32),
        in_specs=[vmem] * (1 + len(params)),
        out_specs=vmem,
    )(xp, *params)
    return out[:n, 0]                                           # == output.squeeze(1) -> (B,)


# ---------------------------------------------------------------------------
# Pure-JAX reference of the PyTorch forward (for a correctness check).
# ---------------------------------------------------------------------------
def cnn_reference(x, raw):
    (conv1_w, conv1_b, conv2_w, conv2_b, fc1_w, fc1_b,
     fc2_w, fc2_b, cls_w, cls_b) = raw

    def conv1d(inp, w, b):
        Lin, Kw = inp.shape[2], w.shape[2]
        out = sum(jnp.einsum('bcl,oc->bol', inp[:, :, k:Lin - Kw + 1 + k], w[:, :, k])
                  for k in range(Kw))
        return out + b[None, :, None]

    def avgpool(inp):
        return 0.5 * (inp[:, :, 0::2] + inp[:, :, 1::2])

    h = x[:, None, :]
    h = avgpool(jax.nn.relu(conv1d(h, conv1_w, conv1_b)))
    h = avgpool(jax.nn.relu(conv1d(h, conv2_w, conv2_b)))
    h = h.reshape(x.shape[0], -1)                               # (B, 960)
    h = jax.nn.relu(h @ fc1_w.T + fc1_b)                        # dropout = identity (eval)
    h = h @ fc2_w.T + fc2_b
    logit = h @ cls_w.T + cls_b
    return jax.nn.sigmoid(logit)[:, 0]


if __name__ == "__main__":
    x = jax.random.normal(jax.random.PRNGKey(0), (B, L0), jnp.float32)
    raw = make_raw_params(jax.random.PRNGKey(1))
    params = pack_params(raw)

    y = cnn_forward(x, params)
    jax.block_until_ready(y)

    y_ref = cnn_reference(x, raw)
    assert y.shape == (B,)
    assert bool(jnp.all((y >= 0.0) & (y <= 1.0)))
    # bf16 fc1 matmul vs. f32 reference -> small drift; tolerance covers it comfortably.
    assert jnp.allclose(y, y_ref, atol=2e-2, rtol=2e-2), (y, y_ref)
    print("KERNEL_OK")
</pallas_src>

<mosaic_0001>
module attributes {stable_mosaic.version = 11 : i64} {
  func.func @cnn_kernel(%arg0: memref<8x1x126xf32, #tpu.memory_space<vmem>>, %arg1: memref<3x16x1xf32, #tpu.memory_space<vmem>>, %arg2: memref<16x1xf32, #tpu.memory_space<vmem>>, %arg3: memref<124x62xf32, #tpu.memory_space<vmem>>, %arg4: memref<32x48xf32, #tpu.memory_space<vmem>>, %arg5: memref<32x1xf32, #tpu.memory_space<vmem>>, %arg6: memref<1920x128xbf16, #tpu.memory_space<vmem>>, %arg7: memref<1x128xf32, #tpu.memory_space<vmem>>, %arg8: memref<1x128xf32, #tpu.memory_space<vmem>>, %arg9: memref<1x1xf32, #tpu.memory_space<vmem>>, %arg10: memref<8x1xf32, #tpu.memory_space<vmem>>) attributes {dimension_semantics = [], scalar_prefetch = 0 : i64, scratch_operands = 0 : i64, tpu.core_type = #tpu.core_type<tc>} {
    %c0 = arith.constant 0 : index
    %c0_0 = arith.constant 0 : index
    %c0_1 = arith.constant 0 : index
    %0 = vector.load %arg0[%c0, %c0_0, %c0_1] : memref<8x1x126xf32, #tpu.memory_space<vmem>>, vector<8x1x126xf32>
    %1 = vector.extract_strided_slice %0 {offsets = [0, 0, 0], sizes = [8, 1, 124], strides = [1, 1, 1]} : vector<8x1x126xf32> to vector<8x1x124xf32>
    %c0_2 = arith.constant 0 : index
    %c0_3 = arith.constant 0 : index
    %c0_4 = arith.constant 0 : index
    %2 = vector.load %arg1[%c0_2, %c0_3, %c0_4] : memref<3x16x1xf32, #tpu.memory_space<vmem>>, vector<1x16x1xf32>
    %3 = vector.shape_cast %2 : vector<1x16x1xf32> to vector<16x1xf32>
    %4 = vector.shape_cast %3 : vector<16x1xf32> to vector<1x16x1xf32>
    %5 = vector.broadcast %1 : vector<8x1x124xf32> to vector<8x16x124xf32>
    %6 = vector.broadcast %4 : vector<1x16x1xf32> to vector<8x16x124xf32>
    %7 = arith.mulf %5, %6 : vector<8x16x124xf32>
    %8 = vector.extract_strided_slice %0 {offsets = [0, 0, 1], sizes = [8, 1, 124], strides = [1, 1, 1]} : vector<8x1x126xf32> to vector<8x1x124xf32>
    %c1 = arith.constant 1 : index
    %c0_5 = arith.constant 0 : index
    %c0_6 = arith.constant 0 : index
    %9 = vector.load %arg1[%c1, %c0_5, %c0_6] : memref<3x16x1xf32, #tpu.memory_space<vmem>>, vector<1x16x1xf32>
    %10 = vector.shape_cast %9 : vector<1x16x1xf32> to vector<16x1xf32>
    %11 = vector.shape_cast %10 : vector<16x1xf32> to vector<1x16x1xf32>
    %12 = vector.broadcast %8 : vector<8x1x124xf32> to vector<8x16x124xf32>
    %13 = vector.broadcast %11 : vector<1x16x1xf32> to vector<8x16x124xf32>
    %14 = arith.mulf %12, %13 : vector<8x16x124xf32>
    %15 = arith.addf %7, %14 : vector<8x16x124xf32>
    %16 = vector.extract_strided_slice %0 {offsets = [0, 0, 2], sizes = [8, 1, 124], strides = [1, 1, 1]} : vector<8x1x126xf32> to vector<8x1x124xf32>
    %c2 = arith.constant 2 : index
    %c0_7 = arith.constant 0 : index
    %c0_8 = arith.constant 0 : index
    %17 = vector.load %arg1[%c2, %c0_7, %c0_8] : memref<3x16x1xf32, #tpu.memory_space<vmem>>, vector<1x16x1xf32>
    %18 = vector.shape_cast %17 : vector<1x16x1xf32> to vector<16x1xf32>
    %19 = vector.shape_cast %18 : vector<16x1xf32> to vector<1x16x1xf32>
    %20 = vector.broadcast %16 : vector<8x1x124xf32> to vector<8x16x124xf32>
    %21 = vector.broadcast %19 : vector<1x16x1xf32> to vector<8x16x124xf32>
    %22 = arith.mulf %20, %21 : vector<8x16x124xf32>
    %23 = arith.addf %15, %22 : vector<8x16x124xf32>
    %c0_9 = arith.constant 0 : index
    %c0_10 = arith.constant 0 : index
    %24 = vector.load %arg2[%c0_9, %c0_10] : memref<16x1xf32, #tpu.memory_space<vmem>>, vector<16x1xf32>
    %25 = vector.shape_cast %24 : vector<16x1xf32> to vector<1x16x1xf32>
    %26 = vector.broadcast %25 : vector<1x16x1xf32> to vector<8x16x124xf32>
    %27 = arith.addf %23, %26 : vector<8x16x124xf32>
    %cst = arith.constant 0.000000e+00 : f32
    %28 = vector.broadcast %cst : f32 to vector<8x16x124xf32>
    %29 = arith.maximumf %27, %28 : vector<8x16x124xf32>
    %30 = vector.shape_cast %29 : vector<8x16x124xf32> to vector<128x124xf32>
    %c0_11 = arith.constant 0 : index
    %c0_12 = arith.constant 0 : index
    %31 = vector.load %arg3[%c0_11, %c0_12] : memref<124x62xf32, #tpu.memory_space<vmem>>, vector<124x62xf32>
    %cst_13 = arith.constant dense<0.000000e+00> : vector<128x62xf32>
    %32 = tpu.matmul %30, %31, %cst_13 {dimension_numbers = #tpu.dot_dimension_numbers<[1], [0], [0], [1], [0, 0, 1, 1], [], []>} : vector<128x124xf32>, vector<124x62xf32>, vector<128x62xf32> -> vector<128x62xf32>
    %33 = vector.shape_cast %32 : vector<128x62xf32> to vector<8x16x62xf32>
    %34 = vector.extract_strided_slice %33 {offsets = [0, 0, 0], sizes = [8, 16, 60], strides = [1, 1, 1]} : vector<8x16x62xf32> to vector<8x16x60xf32>
    %35 = vector.extract_strided_slice %33 {offsets = [0, 0, 1], sizes = [8, 16, 60], strides = [1, 1, 1]} : vector<8x16x62xf32> to vector<8x16x60xf32>
    %36 = vector.extract_strided_slice %33 {offsets = [0, 0, 2], sizes = [8, 16, 60], strides = [1, 1, 1]} : vector<8x16x62xf32> to vector<8x16x60xf32>
    %37 = tpu.concatenate %34, %35, %36 in 1 : vector<8x16x60xf32>, vector<8x16x60xf32>, vector<8x16x60xf32> -> vector<8x48x60xf32>
    %c0_14 = arith.constant 0 : index
    %c0_15 = arith.constant 0 : index
    %38 = vector.load %arg4[%c0_14, %c0_15] : memref<32x48xf32, #tpu.memory_space<vmem>>, vector<32x48xf32>
    %39 = vector.shape_cast %38 : vector<32x48xf32> to vector<1x32x48xf32>
    %40 = vector.broadcast %39 : vector<1x32x48xf32> to vector<8x32x48xf32>
    "tpu.trace_start"() <{level = 10 : i32, message = "boc,bct->bot"}> : () -> ()
    %cst_16 = arith.constant dense<0.000000e+00> : vector<8x32x60xf32>
    %41 = tpu.matmul %40, %37, %cst_16 {dimension_numbers = #tpu.dot_dimension_numbers<[2], [1], [1], [2], [0, 0, 0, 1, 1, 2], [0], [0]>} : vector<8x32x48xf32>, vector<8x48x60xf32>, vector<8x32x60xf32> -> vector<8x32x60xf32>
    "tpu.trace_stop"() : () -> ()
    %c0_17 = arith.constant 0 : index
    %c0_18 = arith.constant 0 : index
    %42 = vector.load %arg5[%c0_17, %c0_18] : memref<32x1xf32, #tpu.memory_space<vmem>>, vector<32x1xf32>
    %43 = vector.shape_cast %42 : vector<32x1xf32> to vector<1x32x1xf32>
    %44 = vector.broadcast %43 : vector<1x32x1xf32> to vector<8x32x60xf32>
    %45 = arith.addf %41, %44 : vector<8x32x60xf32>
    %cst_19 = arith.constant 0.000000e+00 : f32
    %46 = vector.broadcast %cst_19 : f32 to vector<8x32x60xf32>
    %47 = arith.maximumf %45, %46 : vector<8x32x60xf32>
    %48 = vector.shape_cast %47 : vector<8x32x60xf32> to vector<8x1920xf32>
    %49 = arith.truncf %48 : vector<8x1920xf32> to vector<8x1920xbf16>
    %c0_20 = arith.constant 0 : index
    %c0_21 = arith.constant 0 : index
    %50 = vector.load %arg6[%c0_20, %c0_21] : memref<1920x128xbf16, #tpu.memory_space<vmem>>, vector<1920x128xbf16>
    %cst_22 = arith.constant dense<0.000000e+00> : vector<8x128xf32>
    %51 = tpu.matmul %49, %50, %cst_22 {dimension_numbers = #tpu.dot_dimension_numbers<[1], [0], [0], [1], [0, 0, 1, 1], [], []>} : vector<8x1920xbf16>, vector<1920x128xbf16>, vector<8x128xf32> -> vector<8x128xf32>
    %c0_23 = arith.constant 0 : index
    %c0_24 = arith.constant 0 : index
    %52 = vector.load %arg7[%c0_23, %c0_24] : memref<1x128xf32, #tpu.memory_space<vmem>>, vector<1x128xf32>
    %53 = vector.broadcast %52 : vector<1x128xf32> to vector<8x128xf32>
    %54 = arith.addf %51, %53 : vector<8x128xf32>
    %cst_25 = arith.constant 0.000000e+00 : f32
    %55 = vector.broadcast %cst_25 : f32 to vector<8x128xf32>
    %56 = arith.maximumf %54, %55 : vector<8x128xf32>
    %c0_26 = arith.constant 0 : index
    %c0_27 = arith.constant 0 : index
    %57 = vector.load %arg8[%c0_26, %c0_27] : memref<1x128xf32, #tpu.memory_space<vmem>>, vector<1x128xf32>
    %58 = vector.broadcast %57 : vector<1x128xf32> to vector<8x128xf32>
    %59 = arith.mulf %56, %58 : vector<8x128xf32>
    %cst_28 = arith.constant dense<0.000000e+00> : vector<8xf32>
    %60 = vector.multi_reduction <add>, %59, %cst_28 [1] : vector<8x128xf32> to vector<8xf32>
    %61 = vector.shape_cast %60 : vector<8xf32> to vector<8x1xf32>
    %c0_29 = arith.constant 0 : index
    %c0_30 = arith.constant 0 : index
    %62 = vector.load %arg9[%c0_29, %c0_30] : memref<1x1xf32, #tpu.memory_space<vmem>>, vector<1x1xf32>
    %63 = vector.broadcast %62 : vector<1x1xf32> to vector<8x1xf32>
    %64 = arith.addf %61, %63 : vector<8x1xf32>
    %65 = arith.negf %64 : vector<8x1xf32>
    %66 = math.exp %65 : vector<8x1xf32>
    %cst_31 = arith.constant 1.000000e+00 : f32
    %67 = vector.broadcast %cst_31 : f32 to vector<8x1xf32>
    %68 = arith.addf %67, %66 : vector<8x1xf32>
    %69 = arith.divf %67, %68 : vector<8x1xf32>
    %c0_32 = arith.constant 0 : index
    %c0_33 = arith.constant 0 : index
    %70 = vector.load %arg10[%c0_32, %c0_33] : memref<8x1xf32, #tpu.memory_space<vmem>>, vector<8x1xf32>
    tpu.vector_store %arg10[%c0_32, %c0_33], %69 {strides = array<i32>} : memref<8x1xf32, #tpu.memory_space<vmem>>, vector<8x1xf32>,
    return
  }
}

</mosaic_0001>

<bundles_post_ra>
// kernel: tpu_custom_call.1
= control target key start
LH: loop header
LB: loop body
LE: loop exit
PB: predicated region body
PF: predicated region fallthrough
CT: control target
= control target key end

     0   :  { %s5348_s0 = inlined_call_operand.vmem [shape: f32[8,1,126], index: 0, kind: input, shape index: {}]   ;;  %s5349_s1 = inlined_call_operand.vmem [shape: f32[3,16,1], index: 1, kind: input, shape index: {}]   ;;  %s5350_s2 = inlined_call_operand.vmem [shape: f32[16,1], index: 2, kind: input, shape index: {}]   ;;  %s5351_s3 = inlined_call_operand.vmem [shape: f32[124,62], index: 3, kind: input, shape index: {}]   ;;  %s5352_s4 = inlined_call_operand.vmem [shape: f32[32,48], index: 4, kind: input, shape index: {}]   ;;  %s5353_s5 = inlined_call_operand.vmem [shape: f32[32,1], index: 5, kind: input, shape index: {}]   ;;  %s5354_s6 = inlined_call_operand.hbm [shape: bf16[1920,128], index: 6, kind: input, shape index: {}]   ;;  %s5355_s7 = inlined_call_operand.vmem [shape: f32[1,128], index: 7, kind: input, shape index: {}]   ;;  %s5356_s8 = inlined_call_operand.vmem [shape: f32[1,128], index: 8, kind: input, shape index: {}]   ;;  %s5357_s9 = inlined_call_operand.<no memory space> [shape: f32[1,1], index: 9, kind: input, shape index: {}]   ;;  %s5358_s10 = inlined_call_operand.vmem [shape: f32[8,1], index: 10, kind: output, shape index: {}]  }
   0x1   :  { %v15_v0 = vstv %s5357_s9 }
   0x2   :  { %16 = vst [vmem:[#allocation2] sm:$0x1] %v15_v0 }
   0x3   :  { %17 = vsyncpa [#allocation4], 0  ;;  %s4406_s15 = smov [#allocation3]  }
   0x4   :  { %s35_s16 = sshll.u32 %s4406_s15, 4  ;;  %s36_s16 = int_to_ptr.vmem [resolvable:$true] %s35_s16 }
   0x5   :  { %s4392_s17 = scalar_lea.vmem %s36_s16, 15360  ;;  %p4397_p1 = scmp.lt.s32.totalorder %s36_s16, %s36_s16 }
   0x6   :  { %p4393_p0 = scmp.ne.s32.totalorder %s36_s16, %s4392_s17  ;;  %p4398_p2 = scmp.lt.s32.totalorder %s4392_s17, %s4392_s17 }
   0x8   :  { %p4399_p3 = por %p4398_p2, %p4397_p1 }
   0xa   :  { %p4400_p4 = pnand %p4399_p3, %p4393_p0 }
   0xc   :  { %4403 = shalt.err (!%p4400_p4)
}
   0xd   :  { %s4407_s18 = smov 64   ;;  %s4408_s19 = smov 4  }
   0xe   :  { %41 = dma.hbm_to_vmem [thread:$0]  %s5354_s6, 15360, %s36_s16, [#allocation4], %s4407_s18, %s4407_s18, %s4408_s19  }
   0xf   :  { %4404 = dma.done.wait [#allocation4], 15360  }
  0x10   :  { %4405 = vsyncadd [#allocation4], 4294951936  ;;  %v4409_v1 = vmov 0   ;;  %v3549_v2 = vld [vmem:[%s5349_s1 + $0x20] sm:$0xff]  ;;  %v3547_v3 = vld [vmem:[%s5349_s1 + $0x10] sm:$0xff]  ;;  %vm463_vm0 = vcmask 1043456  }
  0x11   :  { %4259 = vset.pattern.permute.xlu1 %v4409_v1  ;;  %4258 = vset.pattern.permute.xlu0 %v4409_v1  ;;  %v3550_v4 = vld [vmem:[%s5349_s1 + $0x28] sm:$0xff]  ;;  %v3548_v5 = vld [vmem:[%s5349_s1 + $0x18] sm:$0xff]  ;;  %v60_v7 = vld [vmem:[%s5349_s1] sm:$0xff]  ;;  %s4410_s6 = smov 126   ;;  %s4411_s27 = smov 127   ;;  %vm414_vm1 = vcmask 1014784  }
  0x12   :  { %250 = vperm.xlu1 %4259, %v3549_v2   ;;  %141 = vperm.xlu0 %4258, %v3547_v3   ;;  %v61_v6 = vld [vmem:[%s5349_s1 + $0x8] sm:$0xff]  ;;  %v354_v8 = vld [vmem:[%s5350_s2] sm:$0xff]  ;;  %v413_v10 = vld [vmem:[%s5351_s3 + $0x78] sm:$0xf]  ;;  %vm752_vm2 = vcmask 392192   ;;  %s4415_s12 = smov 120  }
  0x13   :  { %v355_v9 = vld [vmem:[%s5350_s2 + $0x8] sm:$0xff]  ;;  %v412_v11 = vld [vmem:[%s5351_s3 + $0x70] sm:$0xff]  ;;  %3999 = vmatprep.subr.msk.mxu0 %vm463_vm0, %v413_v10  ;;  %v410_v13 = vld [vmem:[%s5351_s3 + $0x60] sm:$0xff]  ;;  %s4416_s13 = smov 112   ;;  %s4417_s14 = smov 60   ;;  %vm2149_vm3 = vcmask 424960  }
  0x14   :  { %4000 = vmatpush3.msk.msra.mxu0 %vm463_vm0, %v413_v10  ;;  %v411_v12 = vld [vmem:[%s5351_s3 + $0x68] sm:$0xff]  ;;  %v409_v14 = vld [vmem:[%s5351_s3 + $0x58] sm:$0xff]  ;;  %v408_v15 = vld [vmem:[%s5351_s3 + $0x50] sm:$0xff]  ;;  %s4418_s15 = smov 36   ;;  %s4419_s16 = smov 104   ;;  %vm2151_vm4 = vcmask 916480  }
  0x15   :  { %4001 = vmatprep.subr.mxu0 %v412_v11  ;;  %v407_v16 = vld [vmem:[%s5351_s3 + $0x48] sm:$0xff]  ;;  %v406_v17 = vld [vmem:[%s5351_s3 + $0x40] sm:$0xff]  ;;  %v405_v18 = vld [vmem:[%s5351_s3 + $0x38] sm:$0xff]  ;;  %s4420_s17 = smov 96   ;;  %s4421_s20 = smov 44   ;;  %vm2145_vm5 = vcmask 490496  }
  0x16   :  { %255 = vperm.xlu1 %4259, %v3550_v4   ;;  %146 = vperm.xlu0 %4258, %v3548_v5   ;;  %v404_v19 = vld [vmem:[%s5351_s3 + $0x30] sm:$0xff]  ;;  %v403_v20 = vld [vmem:[%s5351_s3 + $0x28] sm:$0xff]  ;;  %v402_v21 = vld [vmem:[%s5351_s3 + $0x20] sm:$0xff]  ;;  %s4422_s21 = smov 20   ;;  %s4423_s1 = smov 88   ;;  %vm2147_vm6 = vcmask 982016  }
  0x17   :  { %4002 = vmatpush3.msra.mxu0 %v412_v11  ;;  %v401_v22 = vld [vmem:[%s5351_s3 + $0x18] sm:$0xff]  ;;  %v4575_v23 = vld [vmem:[%s5348_s0] ss:$0 sm:$0xff]  ;;  %v400_v28 = vld [vmem:[%s5351_s3 + $0x10] sm:$0xff]  ;;  %s4425_s9 = smov 28   ;;  %s4426_s22 = smov 72  }
  0x18   :  { %4003 = vmatprep.subr.mxu0 %v411_v12  ;;  %v4591_v29 = vld [vmem:[%s5348_s0 + $0x1] ss:$0 sm:$0xff]  ;;  %v399_v30 = vld [vmem:[%s5351_s3 + $0x8] sm:$0xff]  ;;  %v4618_v38 = vld [vmem:[%s5348_s0 + $0x2] ss:$0 sm:$0xff]  ;;  %s4427_s23 = smov 12  }
  0x19   :  { %4004 = vmatpush3.msra.mxu0 %v411_v12  ;;  %v398_v34 = vld [vmem:[%s5351_s3] sm:$0xff]  ;;  %s4429_s2 = smov 124   ;;  %s4431_s24 = smov 48   ;;  %vm2157_vm7 = vcmask 293888   ;;  %vm2159_vm8 = vcmask 785408   ;;  %vm2153_vm9 = vcmask 359424  }
  0x1a   :  { %117 = vperm.xlu1 %4259, %v61_v6   ;;  %112 = vperm.xlu0 %4258, %v60_v7   ;;  %v4635_v43 = vld [vmem:[%s5348_s0 + $0x3] ss:$0 sm:$0xff]  ;;  %v4652_v48 = vld [vmem:[%s5348_s0 + $0x4] ss:$0 sm:$0xff]  ;;  %v4669_v53 = vld [vmem:[%s5348_s0 + $0x5] ss:$0 sm:$0xff] }
  0x1b   :  { %4005 = vmatprep.subr.mxu0 %v410_v13  ;;  %v4686_v58 = vld [vmem:[%s5348_s0 + $0x6] ss:$0 sm:$0xff]  ;;  %v4703_v63 = vld [vmem:[%s5348_s0 + $0x7] ss:$0 sm:$0xff]  ;;  %s4424_s0 = smov 80   ;;  %s4432_s25 = smov 100  }
  0x1c   :  { %4006 = vmatpush3.msra.mxu0 %v410_v13  ;;  %s4433_s26 = smov 108   ;;  %s4434_s28 = smov 40   ;;  %vm2155_vm10 = vcmask 850944   ;;  %vm2165_vm11 = vcmask 162816   ;;  %vm2167_vm12 = vcmask 654336   ;;  %vm2173_vm13 = vcmask 31744  }
  0x1d   :  { %4007 = vmatprep.subr.mxu0 %v409_v14  ;;  %s4435_s29 = smov 32   ;;  %s4439_s30 = smov 16   ;;  %vm2175_vm14 = vcmask 523264   ;;  %vm2161_vm15 = vcmask 228352   ;;  %vm2163_vm0 = vcmask 719872  }
  0x1e   :  { %358 = vperm.xlu0 %4258, %v354_v8   ;;  %4008 = vmatpush3.msra.mxu0 %v409_v14  ;;  %s4440_s11 = smov 8   ;;  %s4441_s3 = smov 76  }
  0x1f   :  { %4009 = vmatprep.subr.mxu0 %v408_v15 }
  0x20   :  { %4010 = vmatpush3.msra.mxu0 %v408_v15 }
  0x21   :  { %4011 = vmatprep.subr.mxu0 %v407_v16 }
  0x22   :  { %363 = vperm.xlu0 %4258, %v355_v9   ;;  %4012 = vmatpush3.msra.mxu0 %v407_v16 }
  0x23   :  { %4013 = vmatprep.subr.mxu0 %v406_v17 }
  0x24   :  { %4014 = vmatpush3.msra.mxu0 %v406_v17 }
  0x25   :  { %4015 = vmatprep.subr.mxu0 %v405_v18 }
  0x26   :  { %4016 = vmatpush3.msra.mxu0 %v405_v18 }
  0x27   :  { %4017 = vmatprep.subr.mxu0 %v404_v19 }
  0x28   :  { %4018 = vmatpush3.msra.mxu0 %v404_v19 }
  0x29   :  { %4019 = vmatprep.subr.mxu0 %v403_v20 }
  0x2a   :  { %4020 = vmatpush3.msra.mxu0 %v403_v20 }
  0x2b   :  { %4021 = vmatprep.subr.mxu0 %v402_v21 }
  0x2c   :  { %4022 = vmatpush3.msra.mxu0 %v402_v21 }
  0x2d   :  { %4023 = vmatprep.subr.mxu0 %v401_v22 }
  0x2e   :  { %4024 = vmatpush3.msra.mxu0 %v401_v22 }
  0x2f   :  { %4025 = vmatprep.subr.mxu0 %v400_v28 }
  0x30   :  { %4026 = vmatpush3.msra.mxu0 %v400_v28 }
  0x31   :  { %4027 = vmatprep.subr.mxu0 %v399_v30 }
  0x32   :  { %4028 = vmatpush3.msra.mxu0 %v399_v30 }
  0x33   :  { %4029 = vmatprep.subr.mxu0 %v398_v34 }
  0x34   :  { %4030 = vmatpush3.msra.mxu0 %v398_v34 }
  0x8d   :  { %v4577_v24 = vpop.permute.xlu1 %250  ;;  %v4579_v25 = vpop.permute.xlu0 %141 }
  0x8e   :  { %v258_v26 = vmul.f32 %v4575_v23, %v4577_v24  ;;  %v149_v27 = vmul.f32 %v4575_v23, %v4579_v25  ;;  %v151_v32 = vmul.f32 %v4591_v29, %v4579_v25  ;;  %v260_v36 = vmul.f32 %v4591_v29, %v4577_v24 }
  0x8f   :  { %v153_v39 = vmul.f32 %v4618_v38, %v4579_v25  ;;  %v262_v41 = vmul.f32 %v4618_v38, %v4577_v24  ;;  %v155_v44 = vmul.f32 %v4635_v43, %v4579_v25  ;;  %v264_v46 = vmul.f32 %v4635_v43, %v4577_v24 }
  0x90   :  { %290 = vrot.lane.b32.xlu0 %v258_v26, %s4410_s6  ;;  %181 = vrot.lane.b32.xlu1 %v149_v27, %s4411_s27  ;;  %v157_v49 = vmul.f32 %v4652_v48, %v4579_v25  ;;  %v266_v51 = vmul.f32 %v4652_v48, %v4577_v24  ;;  %v159_v54 = vmul.f32 %v4669_v53, %v4579_v25 }
  0x91   :  { %v4598_v31 = vpop.permute.xlu0 %146  ;;  %v4607_v35 = vpop.permute.xlu1 %255  ;;  %v268_v56 = vmul.f32 %v4669_v53, %v4577_v24  ;;  %v161_v59 = vmul.f32 %v4686_v58, %v4579_v25  ;;  %v270_v61 = vmul.f32 %v4686_v58, %v4577_v24  ;;  %v163_v0 = vmul.f32 %v4703_v63, %v4579_v25 }
  0x92   :  { %v150_v33 = vmul.f32 %v4575_v23, %v4598_v31  ;;  %v259_v37 = vmul.f32 %v4575_v23, %v4607_v35  ;;  %v152_v40 = vmul.f32 %v4591_v29, %v4598_v31  ;;  %v261_v42 = vmul.f32 %v4591_v29, %v4607_v35 }
  0x93   :  { %v154_v45 = vmul.f32 %v4618_v38, %v4598_v31  ;;  %v263_v47 = vmul.f32 %v4618_v38, %v4607_v35  ;;  %v156_v50 = vmul.f32 %v4635_v43, %v4598_v31  ;;  %v265_v52 = vmul.f32 %v4635_v43, %v4607_v35 }
  0x94   :  { %185 = vrot.lane.b32.xlu0 %v151_v32, %s4411_s27  ;;  %183 = vrot.lane.b32.xlu1 %v150_v33, %s4411_s27  ;;  %v158_v55 = vmul.f32 %v4652_v48, %v4598_v31  ;;  %v267_v57 = vmul.f32 %v4652_v48, %v4607_v35  ;;  %v160_v60 = vmul.f32 %v4669_v53, %v4598_v31 }
  0x95   :  { %v269_v62 = vmul.f32 %v4669_v53, %v4607_v35  ;;  %v162_v1 = vmul.f32 %v4686_v58, %v4598_v31  ;;  %v272_v2 = vmul.f32 %v4703_v63, %v4577_v24  ;;  %v271_v3 = vmul.f32 %v4686_v58, %v4607_v35  ;;  %v4725_v6 = vpop.permute.xlu0 %112  ;;  %v4729_v8 = vpop.permute.xlu1 %117 }
  0x96   :  { %v164_v4 = vmul.f32 %v4703_v63, %v4598_v31  ;;  %v273_v5 = vmul.f32 %v4703_v63, %v4607_v35  ;;  %v120_v10 = vmul.f32 %v4575_v23, %v4725_v6  ;;  %v122_v17 = vmul.f32 %v4591_v29, %v4725_v6 }
  0x97   :  { %v121_v18 = vmul.f32 %v4575_v23, %v4729_v8  ;;  %v124_v34 = vmul.f32 %v4618_v38, %v4725_v6  ;;  %v123_v35 = vmul.f32 %v4591_v29, %v4729_v8  ;;  %v126_v29 = vmul.f32 %v4635_v43, %v4725_v6 }
  0x98   :  { %294 = vrot.lane.b32.xlu0 %v260_v36, %s4410_s6  ;;  %292 = vrot.lane.b32.xlu1 %v259_v37, %s4410_s6 }
  0x99   :  { %v4727_v7 = vpop.permute.xlu0 %358 }
  0x9c   :  { %189 = vrot.lane.b32.xlu0 %v153_v39, %s4411_s27  ;;  %187 = vrot.lane.b32.xlu1 %v152_v40, %s4411_s27 }
  0x9d   :  { %v4731_v9 = vpop.permute.xlu0 %363 }
  0xa0   :  { %298 = vrot.lane.b32.xlu0 %v262_v41, %s4410_s6  ;;  %296 = vrot.lane.b32.xlu1 %v261_v42, %s4410_s6 }
  0xa4   :  { %193 = vrot.lane.b32.xlu0 %v155_v44, %s4411_s27  ;;  %191 = vrot.lane.b32.xlu1 %v154_v45, %s4411_s27 }
  0xa8   :  { %302 = vrot.lane.b32.xlu0 %v264_v46, %s4410_s6  ;;  %300 = vrot.lane.b32.xlu1 %v263_v47, %s4410_s6 }
  0xac   :  { %197 = vrot.lane.b32.xlu0 %v157_v49, %s4411_s27  ;;  %195 = vrot.lane.b32.xlu1 %v156_v50, %s4411_s27 }
  0xb0   :  { %306 = vrot.lane.b32.xlu0 %v266_v51, %s4410_s6  ;;  %304 = vrot.lane.b32.xlu1 %v265_v52, %s4410_s6  ;;  %v125_v51 = vmul.f32 %v4618_v38, %v4729_v8  ;;  %v128_v38 = vmul.f32 %v4652_v48, %v4725_v6 }
  0xb4   :  { %201 = vrot.lane.b32.xlu0 %v159_v54, %s4411_s27  ;;  %199 = vrot.lane.b32.xlu1 %v158_v55, %s4411_s27 }
  0xb8   :  { %310 = vrot.lane.b32.xlu0 %v268_v56, %s4410_s6  ;;  %308 = vrot.lane.b32.xlu1 %v267_v57, %s4410_s6 }
  0xbc   :  { %205 = vrot.lane.b32.xlu0 %v161_v59, %s4411_s27  ;;  %203 = vrot.lane.b32.xlu1 %v160_v60, %s4411_s27 }
  0xc0   :  { %314 = vrot.lane.b32.xlu0 %v270_v61, %s4410_s6  ;;  %312 = vrot.lane.b32.xlu1 %v269_v62, %s4410_s6 }
  0xc4   :  { %209 = vrot.lane.b32.xlu0 %v163_v0, %s4411_s27  ;;  %207 = vrot.lane.b32.xlu1 %v162_v1, %s4411_s27 }
  0xc8   :  { %318 = vrot.lane.b32.xlu0 %v272_v2, %s4410_s6  ;;  %316 = vrot.lane.b32.xlu1 %v271_v3, %s4410_s6  ;;  %v127_v3 = vmul.f32 %v4635_v43, %v4729_v8  ;;  %v130_v43 = vmul.f32 %v4669_v53, %v4725_v6 }
  0xcc   :  { %211 = vrot.lane.b32.xlu1 %v164_v4, %s4411_s27 }
  0xd0   :  { %320 = vrot.lane.b32.xlu1 %v273_v5, %s4410_s6 }
 0x102   :  { %v291_v11 = vpop.permute.xlu0 %290  ;;  %v182_v12 = vpop.permute.xlu1 %181 }
 0x103   :  { %v229_v13 = vadd.f32 %v182_v12, %v120_v10 }
 0x105   :  { %v338_v14 = vadd.f32 %v291_v11, %v229_v13 }
 0x106   :  { %v186_v15 = vpop.permute.xlu0 %185  ;;  %v184_v16 = vpop.permute.xlu1 %183 }
 0x107   :  { %v366_v19 = vadd.f32 %v4727_v7, %v338_v14  ;;  %v231_v20 = vadd.f32 %v186_v15, %v122_v17  ;;  %v230_v21 = vadd.f32 %v184_v16, %v121_v18 }
 0x109   :  { %v382_v22 = vmax.f32 %v366_v19, 0.0 }
 0x10a   :  { %v295_v24 = vpop.permute.xlu0 %294  ;;  %v293_v25 = vpop.permute.xlu1 %292 }
 0x10b   :  { %v340_v26 = vadd.f32 %v295_v24, %v231_v20  ;;  %v339_v27 = vadd.f32 %v293_v25, %v230_v21  ;;  %4031 = vmatprep.mubr.msk.f32.mxu0 %vm414_vm1, %v382_v22  ;;  %v129_v20 = vmul.f32 %v4652_v48, %v4729_v8  ;;  %v132_v48 = vmul.f32 %v4686_v58, %v4725_v6 }
 0x10d   :  { %v368_v28 = vadd.f32 %v4727_v7, %v340_v26  ;;  %v367_v30 = vadd.f32 %v4731_v9, %v339_v27 }
 0x10e   :  { %v190_v31 = vpop.permute.xlu0 %189  ;;  %v188_v32 = vpop.permute.xlu1 %187 }
 0x10f   :  { %v384_v33 = vmax.f32 %v368_v28, 0.0  ;;  %v383_v23 = vmax.f32 %v367_v30, 0.0  ;;  %v233_v36 = vadd.f32 %v190_v31, %v124_v34  ;;  %v232_v37 = vadd.f32 %v188_v32, %v123_v35 }
 0x110   :  { %v131_v34 = vmul.f32 %v4669_v53, %v4729_v8  ;;  %v134_v53 = vmul.f32 %v4703_v63, %v4725_v6 }
 0x111   :  { %4032 = vmatmul.mubr.msk.f32.vlgmr.msra.gmra.mxu0 %vm414_vm1, %v383_v23 }
 0x112   :  { %v299_v39 = vpop.permute.xlu0 %298  ;;  %v297_v40 = vpop.permute.xlu1 %296  ;;  %4034 = vmatprep.mubr.msk.f32.mxu0 %vm414_vm1, %v384_v33 }
 0x113   :  { %v342_v41 = vadd.f32 %v299_v39, %v233_v36  ;;  %v341_v42 = vadd.f32 %v297_v40, %v232_v37 }
 0x115   :  { %v370_v44 = vadd.f32 %v4727_v7, %v342_v41  ;;  %v369_v45 = vadd.f32 %v4731_v9, %v341_v42 }
 0x116   :  { %v194_v46 = vpop.permute.xlu0 %193  ;;  %v192_v47 = vpop.permute.xlu1 %191 }
 0x117   :  { %v386_v49 = vmax.f32 %v370_v44, 0.0  ;;  %v385_v50 = vmax.f32 %v369_v45, 0.0  ;;  %v235_v52 = vadd.f32 %v194_v46, %v126_v29  ;;  %v234_v54 = vadd.f32 %v192_v47, %v125_v51 }
 0x119   :  { %4035 = vmatmul.mubr.msk.f32.gmra.mxu0 %vm414_vm1, %v385_v50  ;;  %v133_v50 = vmul.f32 %v4686_v58, %v4729_v8  ;;  %v135_v58 = vmul.f32 %v4703_v63, %v4729_v8 }
 0x11a   :  { %v303_v55 = vpop.permute.xlu0 %302  ;;  %v301_v56 = vpop.permute.xlu1 %300  ;;  %4037 = vmatprep.mubr.msk.f32.mxu0 %vm414_vm1, %v386_v49 }
 0x11b   :  { %v344_v57 = vadd.f32 %v303_v55, %v235_v52  ;;  %v343_v59 = vadd.f32 %v301_v56, %v234_v54 }
 0x11d   :  { %v372_v60 = vadd.f32 %v4727_v7, %v344_v57  ;;  %v371_v61 = vadd.f32 %v4731_v9, %v343_v59 }
 0x11e   :  { %v198_v62 = vpop.permute.xlu0 %197  ;;  %v196_v0 = vpop.permute.xlu1 %195 }
 0x11f   :  { %v388_v1 = vmax.f32 %v372_v60, 0.0  ;;  %v387_v2 = vmax.f32 %v371_v61, 0.0  ;;  %v237_v4 = vadd.f32 %v198_v62, %v128_v38  ;;  %v236_v5 = vadd.f32 %v196_v0, %v127_v3 }
 0x121   :  { %4038 = vmatmul.mubr.msk.f32.gmra.mxu0 %vm414_vm1, %v387_v2 }
 0x122   :  { %v307_v10 = vpop.permute.xlu0 %306  ;;  %v305_v11 = vpop.permute.xlu1 %304  ;;  %4040 = vmatprep.mubr.msk.f32.mxu0 %vm414_vm1, %v388_v1 }
 0x123   :  { %v346_v12 = vadd.f32 %v307_v10, %v237_v4  ;;  %v345_v13 = vadd.f32 %v305_v11, %v236_v5 }
 0x125   :  { %v374_v14 = vadd.f32 %v4727_v7, %v346_v12  ;;  %v373_v15 = vadd.f32 %v4731_v9, %v345_v13 }
 0x126   :  { %v202_v16 = vpop.permute.xlu0 %201  ;;  %v200_v17 = vpop.permute.xlu1 %199 }
 0x127   :  { %v390_v18 = vmax.f32 %v374_v14, 0.0  ;;  %v389_v19 = vmax.f32 %v373_v15, 0.0  ;;  %v239_v21 = vadd.f32 %v202_v16, %v130_v43  ;;  %v238_v22 = vadd.f32 %v200_v17, %v129_v20  ;;  %v730_v20 = vld [vmem:[%s5353_s5 + $0x10] sm:$0xff] }
 0x129   :  { %4041 = vmatmul.mubr.msk.f32.gmra.mxu0 %vm414_vm1, %v389_v19  ;;  %v728_v19 = vld [vmem:[%s5353_s5] sm:$0xff] }
 0x12a   :  { %v311_v24 = vpop.permute.xlu0 %310  ;;  %v309_v25 = vpop.permute.xlu1 %308  ;;  %4043 = vmatprep.mubr.msk.f32.mxu0 %vm414_vm1, %v390_v18 }
 0x12b   :  { %v348_v26 = vadd.f32 %v311_v24, %v239_v21  ;;  %v347_v27 = vadd.f32 %v309_v25, %v238_v22  ;;  %v729_v21 = vld [vmem:[%s5353_s5 + $0x8] sm:$0xff]  ;;  %v731_v22 = vld [vmem:[%s5353_s5 + $0x18] sm:$0xff]  ;;  %s4436_s5 = smov 84  }
 0x12d   :  { %v376_v28 = vadd.f32 %v4727_v7, %v348_v26  ;;  %v375_v30 = vadd.f32 %v4731_v9, %v347_v27 }
 0x12e   :  { %v206_v31 = vpop.permute.xlu0 %205  ;;  %v204_v32 = vpop.permute.xlu1 %203 }
 0x12f   :  { %v392_v33 = vmax.f32 %v376_v28, 0.0  ;;  %v391_v23 = vmax.f32 %v375_v30, 0.0  ;;  %v241_v35 = vadd.f32 %v206_v31, %v132_v48  ;;  %v240_v36 = vadd.f32 %v204_v32, %v131_v34  ;;  %v4919_v31 = vld [vmem:[%s5352_s4 + $0x8] sm:$0xff]  ;;  %v4925_v32 = vld [vmem:[%s5352_s4 + $0x10] sm:$0xff]  ;;  %v4935_v48 = vld [vmem:[%s5352_s4 + $0x18] sm:$0xff] }
 0x131   :  { %4044 = vmatmul.mubr.msk.f32.gmra.mxu0 %vm414_vm1, %v391_v23 }
 0x132   :  { %v315_v37 = vpop.permute.xlu0 %314  ;;  %v313_v39 = vpop.permute.xlu1 %312  ;;  %4046 = vmatprep.mubr.msk.f32.mxu0 %vm414_vm1, %v392_v33 }
 0x133   :  { %v350_v40 = vadd.f32 %v315_v37, %v241_v35  ;;  %v349_v41 = vadd.f32 %v313_v39, %v240_v36 }
 0x135   :  { %v378_v42 = vadd.f32 %v4727_v7, %v350_v40  ;;  %v377_v44 = vadd.f32 %v4731_v9, %v349_v41 }
 0x136   :  { %v210_v45 = vpop.permute.xlu0 %209  ;;  %v208_v46 = vpop.permute.xlu1 %207 }
 0x137   :  { %v394_v47 = vmax.f32 %v378_v42, 0.0  ;;  %v393_v49 = vmax.f32 %v377_v44, 0.0  ;;  %v243_v29 = vadd.f32 %v210_v45, %v134_v53  ;;  %v242_v51 = vadd.f32 %v208_v46, %v133_v50 }
 0x139   :  { %4047 = vmatmul.mubr.msk.f32.gmra.mxu0 %vm414_vm1, %v393_v49 }
 0x13a   :  { %v319_v52 = vpop.permute.xlu0 %318  ;;  %v317_v54 = vpop.permute.xlu1 %316  ;;  %4049 = vmatprep.mubr.msk.f32.mxu0 %vm414_vm1, %v394_v47 }
 0x13b   :  { %v352_v55 = vadd.f32 %v319_v52, %v243_v29  ;;  %v351_v56 = vadd.f32 %v317_v54, %v242_v51 }
 0x13d   :  { %v380_v57 = vadd.f32 %v4727_v7, %v352_v55  ;;  %v379_v59 = vadd.f32 %v4731_v9, %v351_v56  ;;  %v4800_v7 = vld [vmem:[%s5352_s4] sm:$0xff]  ;;  %s4414_s4 = smov 52  }
 0x13e   :  { %v212_v60 = vpop.permute.xlu1 %211  ;;  %4067 = vmatprep.mubr.msk.f32.mxu1 %vm752_vm2, %v4800_v7 }
 0x13f   :  { %v396_v61 = vmax.f32 %v380_v57, 0.0  ;;  %v395_v6 = vmax.f32 %v379_v59, 0.0  ;;  %v244_v62 = vadd.f32 %v212_v60, %v135_v58 }
 0x141   :  { %4050 = vmatmul.mubr.msk.f32.gmra.mxu0 %vm414_vm1, %v395_v6 }
 0x142   :  { %v321_v0 = vpop.permute.xlu1 %320  ;;  %4052 = vmatprep.mubr.msk.f32.mxu0 %vm414_vm1, %v396_v61 }
 0x143   :  { %v353_v1 = vadd.f32 %v321_v0, %v244_v62 }
 0x145   :  { %v381_v2 = vadd.f32 %v4731_v9, %v353_v1 }
 0x147   :  { %v397_v38 = vmax.f32 %v381_v2, 0.0  ;;  %v4260_v2 = vld [vmem:[#allocation3 + $0x78] sm:$0xff]  }
 0x149   :  { %4053 = vmatmul.mubr.msk.f32.gmra.mxu0 %vm414_vm1, %v397_v38  ;;  %v4261_v38 = vld [vmem:[#allocation3 + $0x38] sm:$0xff]  }
 0x14a   :  { %4157 = vmatprep.mubr.msk.f32.mxu0 %vm752_vm2, %v4800_v7 }
 0x1d1   :  { %v4802_v3 = vpop.f32.mrf.mxu0 }
 0x1d2   :  { %678 = vrot.lane.b32.xlu0 %v4802_v3, %s4410_s6 }
 0x1d3   :  { %v4810_v63 = vpop.f32.mrf.mxu0 }
 0x1d4   :  { %676 = vrot.lane.b32.xlu1 %v4810_v63, %s4410_s6 }
 0x1d6   :  { %630 = vrot.lane.b32.xlu0 %v4802_v3, %s4411_s27 }
 0x1d8   :  { %628 = vrot.lane.b32.xlu1 %v4810_v63, %s4411_s27 }
 0x1d9   :  { %v4818_v8 = vpop.f32.mrf.mxu0 }
 0x1da   :  { %682 = vrot.lane.b32.xlu0 %v4818_v8, %s4410_s6 }
 0x1db   :  { %v4822_v9 = vpop.f32.mrf.mxu0 }
 0x1dc   :  { %680 = vrot.lane.b32.xlu1 %v4822_v9, %s4410_s6 }
 0x1de   :  { %634 = vrot.lane.b32.xlu0 %v4818_v8, %s4411_s27 }
 0x1e0   :  { %632 = vrot.lane.b32.xlu1 %v4822_v9, %s4411_s27 }
 0x1e1   :  { %v4830_v4 = vpop.f32.mrf.mxu0 }
 0x1e2   :  { %686 = vrot.lane.b32.xlu0 %v4830_v4, %s4410_s6 }
 0x1e3   :  { %v4834_v5 = vpop.f32.mrf.mxu0 }
 0x1e4   :  { %684 = vrot.lane.b32.xlu1 %v4834_v5, %s4410_s6 }
 0x1e6   :  { %638 = vrot.lane.b32.xlu0 %v4830_v4, %s4411_s27 }
 0x1e8   :  { %636 = vrot.lane.b32.xlu1 %v4834_v5, %s4411_s27 }
 0x1e9   :  { %v4842_v10 = vpop.f32.mrf.mxu0 }
 0x1ea   :  { %690 = vrot.lane.b32.xlu0 %v4842_v10, %s4410_s6 }
 0x1eb   :  { %v4846_v11 = vpop.f32.mrf.mxu0 }
 0x1ec   :  { %688 = vrot.lane.b32.xlu1 %v4846_v11, %s4410_s6 }
 0x1ee   :  { %642 = vrot.lane.b32.xlu0 %v4842_v10, %s4411_s27 }
 0x1f0   :  { %640 = vrot.lane.b32.xlu1 %v4846_v11, %s4411_s27 }
 0x1f1   :  { %v4854_v12 = vpop.f32.mrf.mxu0 }
 0x1f2   :  { %694 = vrot.lane.b32.xlu0 %v4854_v12, %s4410_s6 }
 0x1f3   :  { %v4860_v13 = vpop.f32.mrf.mxu0 }
 0x1f6   :  { %646 = vrot.lane.b32.xlu0 %v4854_v12, %s4411_s27 }
 0x1f9   :  { %v4862_v14 = vpop.f32.mrf.mxu0 }
 0x1fa   :  { %692 = vrot.lane.b32.xlu0 %v4860_v13, %s4410_s6  ;;  %698 = vrot.lane.b32.xlu1 %v4862_v14, %s4410_s6 }
 0x1fb   :  { %v4872_v15 = vpop.f32.mrf.mxu0 }
 0x1fe   :  { %644 = vrot.lane.b32.xlu0 %v4860_v13, %s4411_s27  ;;  %650 = vrot.lane.b32.xlu1 %v4862_v14, %s4411_s27 }
 0x201   :  { %v4874_v16 = vpop.f32.mrf.mxu0 }
 0x202   :  { %696 = vrot.lane.b32.xlu1 %v4872_v15, %s4410_s6  ;;  %702 = vrot.lane.b32.xlu0 %v4874_v16, %s4410_s6 }
 0x203   :  { %v4884_v17 = vpop.f32.mrf.mxu0 }
 0x206   :  { %648 = vrot.lane.b32.xlu1 %v4872_v15, %s4411_s27  ;;  %654 = vrot.lane.b32.xlu0 %v4874_v16, %s4411_s27 }
 0x209   :  { %v4886_v18 = vpop.f32.mrf.mxu0 }
 0x20a   :  { %700 = vrot.lane.b32.xlu0 %v4884_v17, %s4410_s6  ;;  %706 = vrot.lane.b32.xlu1 %v4886_v18, %s4410_s6 }
 0x20b   :  { %v4899_v43 = vpop.f32.mrf.mxu0 }
 0x20e   :  { %652 = vrot.lane.b32.xlu0 %v4884_v17, %s4411_s27  ;;  %658 = vrot.lane.b32.xlu1 %v4886_v18, %s4411_s27 }
 0x212   :  { %734 = vperm.xlu0 %4258, %v728_v19   ;;  %704 = vrot.lane.b32.xlu1 %v4899_v43, %s4410_s6  ;;  %s4437_s6 = smov 92  }
 0x216   :  { %744 = vperm.xlu0 %4258, %v730_v20   ;;  %656 = vrot.lane.b32.xlu1 %v4899_v43, %s4411_s27  ;;  %v4270_v20 = vld [vmem:[#allocation3 + $0x20] sm:$0xff]   ;;  %s4438_s27 = smov 24  }
 0x21a   :  { %739 = vperm.xlu1 %4259, %v729_v21  }
 0x21e   :  { %749 = vperm.xlu1 %4259, %v731_v22  }
 0x244   :  { %v679_v24 = vpop.permute.xlu0 %678 }
 0x245   :  { %4055 = vmatprep.subr.mxu1 %v679_v24 }
 0x246   :  { %4056 = vmatpush3.msra.mxu1 %v679_v24  ;;  %v677_v25 = vpop.permute.xlu1 %676  ;;  %v4272_v24 = vld [vmem:[#allocation3 + $0x58] sm:$0xff]  }
 0x247   :  { %4057 = vmatprep.subr.mxu1 %v677_v25 }
 0x248   :  { %v631_v26 = vpop.permute.xlu0 %630  ;;  %4058 = vmatpush3.msra.mxu1 %v677_v25  ;;  %v4279_v25 = vld [vmem:[#allocation3 + $0xa0] sm:$0xff]  }
 0x249   :  { %4059 = vmatprep.subr.mxu1 %v631_v26 }
 0x24a   :  { %4060 = vmatpush3.msra.mxu1 %v631_v26  ;;  %v629_v27 = vpop.permute.xlu1 %628 }
 0x24b   :  { %4061 = vmatprep.subr.mxu1 %v629_v27 }
 0x24c   :  { %4062 = vmatpush3.msra.mxu1 %v629_v27  ;;  %v683_v28 = vpop.permute.xlu0 %682  ;;  %v4281_v27 = vld [vmem:[#allocation3 + $0xd8] sm:$0xff]  }
 0x24d   :  { %4063 = vmatprep.subr.mxu1 %v4802_v3 }
 0x24e   :  { %4064 = vmatpush3.msra.mxu1 %v4802_v3  ;;  %v681_v30 = vpop.permute.xlu1 %680  ;;  %v4265_v3 = vld [vmem:[#allocation3 + $0xf8] sm:$0xff]  }
 0x24f   :  { %4065 = vmatprep.subr.mxu1 %v4810_v63 }
 0x250   :  { %4066 = vmatpush3.msra.mxu1 %v4810_v63  ;;  %v635_v33 = vpop.permute.xlu0 %634 }
 0x251   :  { %4068 = vmatmul.mubr.msk.f32.vlgmr.msra.gmra.mxu1 %vm752_vm2, %v4919_v31  ;;  %4073 = vmatprep.subr.mxu1 %v683_v28 }
 0x252   :  { %4074 = vmatpush3.msra.mxu1 %v683_v28  ;;  %v633_v23 = vpop.permute.xlu1 %632  ;;  %4070 = vmatprep.mubr.msk.f32.mxu1 %vm752_vm2, %v4925_v32  ;;  %v4274_v28 = vld [vmem:[#allocation3 + $0x18] sm:$0xff]  }
 0x253   :  { %4075 = vmatprep.subr.mxu1 %v681_v30 }
 0x254   :  { %4076 = vmatpush3.msra.mxu1 %v681_v30  ;;  %v687_v34 = vpop.permute.xlu0 %686 }
 0x255   :  { %4071 = vmatmul.mubr.msk.f32.gmra.mxu1 %vm752_vm2, %v4935_v48  ;;  %4077 = vmatprep.subr.mxu1 %v635_v33 }
 0x256   :  { %4078 = vmatpush3.msra.mxu1 %v635_v33  ;;  %v685_v35 = vpop.permute.xlu1 %684  ;;  %4085 = vmatprep.mubr.msk.f32.mxu1 %vm752_vm2, %v4800_v7 }
 0x257   :  { %4079 = vmatprep.subr.mxu1 %v633_v23 }
 0x258   :  { %4080 = vmatpush3.msra.mxu1 %v633_v23  ;;  %v639_v36 = vpop.permute.xlu0 %638 }
 0x259   :  { %4081 = vmatprep.subr.mxu1 %v4818_v8 }
 0x25a   :  { %4082 = vmatpush3.msra.mxu1 %v4818_v8  ;;  %v637_v37 = vpop.permute.xlu1 %636  ;;  %v4267_v8 = vld [vmem:[#allocation3 + $0xb8] sm:$0xff]  }
 0x25b   :  { %4083 = vmatprep.subr.mxu1 %v4822_v9 }
 0x25c   :  { %4084 = vmatpush3.msra.mxu1 %v4822_v9  ;;  %v691_v39 = vpop.permute.xlu0 %690  ;;  %v4263_v9 = vld [vmem:[#allocation3 + $0x30] sm:$0xff]  }
 0x25d   :  { %4086 = vmatmul.mubr.msk.f32.vlgmr.msra.gmra.mxu1 %vm752_vm2, %v4919_v31  ;;  %4091 = vmatprep.subr.mxu1 %v687_v34 }
 0x25e   :  { %4092 = vmatpush3.msra.mxu1 %v687_v34  ;;  %4088 = vmatprep.mubr.msk.f32.mxu1 %vm752_vm2, %v4925_v32  ;;  %v689_v41 = vpop.permute.xlu1 %688  ;;  %v4278_v34 = vld [vmem:[#allocation3 + $0x10] sm:$0xff]  }
 0x25f   :  { %4093 = vmatprep.subr.mxu1 %v685_v35 }
 0x260   :  { %4094 = vmatpush3.msra.mxu1 %v685_v35  ;;  %v643_v40 = vpop.permute.xlu0 %642 }
 0x261   :  { %4089 = vmatmul.mubr.msk.f32.gmra.mxu1 %vm752_vm2, %v4935_v48  ;;  %4095 = vmatprep.subr.mxu1 %v639_v36 }
 0x262   :  { %4096 = vmatpush3.msra.mxu1 %v639_v36  ;;  %4103 = vmatprep.mubr.msk.f32.mxu1 %vm752_vm2, %v4800_v7  ;;  %v641_v44 = vpop.permute.xlu1 %640  ;;  %v4280_v36 = vld [vmem:[#allocation3 + $0x48] sm:$0xff]  }
 0x263   :  { %4097 = vmatprep.subr.mxu1 %v637_v37 }
 0x264   :  { %4098 = vmatpush3.msra.mxu1 %v637_v37  ;;  %v695_v42 = vpop.permute.xlu0 %694  ;;  %v4412_v37 = vmov 1983009808  }
 0x265   :  { %4099 = vmatprep.subr.mxu1 %v4830_v4 }
 0x266   :  { %4100 = vmatpush3.msra.mxu1 %v4830_v4  ;;  %v4269_v4 = vld [vmem:[#allocation3 + $0xf0] sm:$0xff]  }
 0x267   :  { %4101 = vmatprep.subr.mxu1 %v4834_v5 }
 0x268   :  { %4102 = vmatpush3.msra.mxu1 %v4834_v5  ;;  %v647_v45 = vpop.permute.xlu0 %646  ;;  %v4264_v5 = vld [vmem:[#allocation3 + $0x68] sm:$0xff]  }
 0x269   :  { %4104 = vmatmul.mubr.msk.f32.vlgmr.msra.gmra.mxu1 %vm752_vm2, %v4919_v31  ;;  %4109 = vmatprep.subr.mxu1 %v691_v39 }
 0x26a   :  { %4110 = vmatpush3.msra.mxu1 %v691_v39  ;;  %4106 = vmatprep.mubr.msk.f32.mxu1 %vm752_vm2, %v4925_v32  ;;  %v1480_v39 = vunpack.c.l.s4 %v4412_v37 }
 0x26b   :  { %4111 = vmatprep.subr.mxu1 %v689_v41 }
 0x26c   :  { %4112 = vmatpush3.msra.mxu1 %v689_v41  ;;  %v693_v46 = vpop.permute.xlu0 %692  ;;  %v699_v47 = vpop.permute.xlu1 %698 }
 0x26d   :  { %4107 = vmatmul.mubr.msk.f32.gmra.mxu1 %vm752_vm2, %v4935_v48  ;;  %4113 = vmatprep.subr.mxu1 %v643_v40 }
 0x26e   :  { %4145 = vmatprep.subr.mxu0 %v699_v47  ;;  %4114 = vmatpush3.msra.mxu1 %v643_v40  ;;  %v1482_v40 = vlaneseq }
 0x26f   :  { %4146 = vmatpush3.msra.mxu0 %v699_v47  ;;  %4115 = vmatprep.subr.mxu1 %v641_v44 }
 0x270   :  { %4116 = vmatpush3.msra.mxu1 %v641_v44  ;;  %v651_v49 = vpop.permute.xlu1 %650  ;;  %4121 = vmatprep.mubr.msk.f32.mxu1 %vm752_vm2, %v4800_v7  ;;  %v645_v53 = vpop.permute.xlu0 %644 }
 0x271   :  { %4117 = vmatprep.subr.mxu1 %v4842_v10 }
 0x272   :  { %4118 = vmatpush3.msra.mxu1 %v4842_v10  ;;  %v4271_v10 = vld [vmem:[#allocation3 + $0xb0] sm:$0xff]  }
 0x273   :  { %4119 = vmatprep.subr.mxu1 %v4846_v11 }
 0x274   :  { %4120 = vmatpush3.msra.mxu1 %v4846_v11  ;;  %v697_v50 = vpop.permute.xlu1 %696  ;;  %v703_v29 = vpop.permute.xlu0 %702 }
 0x275   :  { %4122 = vmatmul.mubr.msk.f32.vlgmr.msra.gmra.mxu1 %vm752_vm2, %v4919_v31  ;;  %4127 = vmatprep.subr.mxu1 %v695_v42 }
 0x276   :  { %4147 = vmatprep.subr.mxu0 %v697_v50  ;;  %4128 = vmatpush3.msra.mxu1 %v695_v42 }
 0x277   :  { %4148 = vmatpush3.msra.mxu0 %v697_v50  ;;  %4129 = vmatprep.subr.mxu1 %v693_v46 }
 0x278   :  { %4149 = vmatprep.subr.mxu0 %v651_v49  ;;  %4124 = vmatprep.mubr.msk.f32.mxu1 %vm752_vm2, %v4925_v32  ;;  %v649_v51 = vpop.permute.xlu1 %648  ;;  %v655_v54 = vpop.permute.xlu0 %654 }
 0x279   :  { %4130 = vmatpush3.msra.mxu1 %v693_v46  ;;  %4150 = vmatpush3.msra.mxu0 %v651_v49  ;;  %v1483_v46 = vshrl.u32 %v1482_v40, 7 }
 0x27a   :  { %4125 = vmatmul.mubr.msk.f32.gmra.mxu1 %vm752_vm2, %v4935_v48  ;;  %4131 = vmatprep.subr.mxu1 %v647_v45 }
 0x27b   :  { %4151 = vmatprep.subr.mxu0 %v649_v51  ;;  %4132 = vmatpush3.msra.mxu1 %v647_v45  ;;  %v1481_v45 = vunpack.c.0.s8 %v1480_v39 }
 0x27c   :  { %4152 = vmatpush3.msra.mxu0 %v649_v51  ;;  %4133 = vmatprep.subr.mxu1 %v645_v53  ;;  %v707_v52 = vpop.permute.xlu1 %706  ;;  %v701_v56 = vpop.permute.xlu0 %700 }
 0x27d   :  { %4153 = vmatprep.subr.mxu0 %v4862_v14  ;;  %4134 = vmatpush3.msra.mxu1 %v645_v53  ;;  %v5047_v50 = vsub.s32 %v1481_v45, %v1483_v46 }
 0x27e   :  { %4154 = vmatpush3.msra.mxu0 %v4862_v14  ;;  %4135 = vmatprep.subr.mxu1 %v4854_v12  ;;  %v4266_v14 = vld [vmem:[#allocation3 + $0x28] sm:$0xff]  }
 0x27f   :  { %4155 = vmatprep.subr.mxu0 %v4872_v15  ;;  %4136 = vmatpush3.msra.mxu1 %v4854_v12  ;;  %v4273_v12 = vld [vmem:[#allocation3 + $0xe8] sm:$0xff]  }
 0x280   :  { %4156 = vmatpush3.msra.mxu0 %v4872_v15  ;;  %4137 = vmatprep.subr.mxu1 %v4860_v13  ;;  %v659_v55 = vpop.permute.xlu1 %658  ;;  %v653_v59 = vpop.permute.xlu0 %652 }
 0x281   :  { %4158 = vmatmul.mubr.msk.f32.vlgmr.msra.gmra.mxu0 %vm752_vm2, %v4919_v31  ;;  %4181 = vmatprep.subr.mxu0 %v707_v52 }
 0x282   :  { %4138 = vmatpush3.msra.mxu1 %v4860_v13  ;;  %4139 = vmatprep.mubr.msk.f32.mxu1 %vm752_vm2, %v4800_v7 }
 0x283   :  { %4182 = vmatpush3.msra.mxu0 %v707_v52  ;;  %4140 = vmatmul.mubr.msk.f32.vlgmr.msra.gmra.mxu1 %vm752_vm2, %v4919_v31 }
 0x284   :  { %4163 = vmatprep.subr.mxu1 %v703_v29  ;;  %4160 = vmatprep.mubr.msk.f32.mxu0 %vm752_vm2, %v4925_v32  ;;  %v705_v57 = vpop.permute.xlu1 %704 }
 0x285   :  { %4164 = vmatpush3.msra.mxu1 %v703_v29  ;;  %4161 = vmatmul.mubr.msk.f32.gmra.mxu0 %vm752_vm2, %v4935_v48 }
 0x286   :  { %4165 = vmatprep.subr.mxu1 %v701_v56  ;;  %4142 = vmatprep.mubr.msk.f32.mxu1 %vm752_vm2, %v4925_v32 }
 0x287   :  { %4166 = vmatpush3.msra.mxu1 %v701_v56  ;;  %4183 = vmatprep.subr.mxu0 %v705_v57 }
 0x288   :  { %4143 = vmatmul.mubr.msk.f32.gmra.mxu1 %vm752_vm2, %v4935_v48  ;;  %4167 = vmatprep.subr.mxu1 %v655_v54  ;;  %v657_v60 = vpop.permute.xlu1 %656 }
 0x289   :  { %4168 = vmatpush3.msra.mxu1 %v655_v54  ;;  %4184 = vmatpush3.msra.mxu0 %v705_v57 }
 0x28a   :  { %4169 = vmatprep.subr.mxu1 %v653_v59  ;;  %4185 = vmatprep.subr.mxu0 %v659_v55 }
 0x28b   :  { %4170 = vmatpush3.msra.mxu1 %v653_v59  ;;  %4186 = vmatpush3.msra.mxu0 %v659_v55 }
 0x28c   :  { %4171 = vmatprep.subr.mxu1 %v4874_v16  ;;  %4187 = vmatprep.subr.mxu0 %v657_v60 }
 0x28d   :  { %4172 = vmatpush3.msra.mxu1 %v4874_v16  ;;  %4188 = vmatpush3.msra.mxu0 %v657_v60  ;;  %v4268_v16 = vld [vmem:[#allocation3 + $0x60] sm:$0xff]  }
 0x28e   :  { %4173 = vmatprep.subr.mxu1 %v4884_v17  ;;  %4189 = vmatprep.subr.mxu0 %v4886_v18 }
 0x28f   :  { %4174 = vmatpush3.msra.mxu1 %v4884_v17  ;;  %4175 = vmatprep.mubr.msk.f32.mxu1 %vm752_vm2, %v4800_v7  ;;  %v4275_v17 = vld [vmem:[#allocation3 + $0xa8] sm:$0xff]  }
 0x290   :  { %4190 = vmatpush3.msra.mxu0 %v4886_v18  ;;  %4176 = vmatmul.mubr.msk.f32.vlgmr.msra.gmra.mxu1 %vm752_vm2, %v4919_v31  ;;  %v4277_v18 = vld [vmem:[#allocation3 + $0xe0] sm:$0xff]  }
 0x291   :  { %4191 = vmatprep.subr.mxu0 %v4899_v43  ;;  %4193 = vmatprep.mubr.msk.f32.mxu0 %vm752_vm2, %v4800_v7  ;;  %v4262_v7 = vld [vmem:[#allocation3 + $0x70] sm:$0xff]  }
 0x292   :  { %4192 = vmatpush3.msra.mxu0 %v4899_v43  ;;  %4178 = vmatprep.mubr.msk.f32.mxu1 %vm752_vm2, %v4925_v32 }
 0x293   :  { %4194 = vmatmul.mubr.msk.f32.vlgmr.msra.gmra.mxu0 %vm752_vm2, %v4919_v31  ;;  %3836 = vmatprep.subr.bf16.mxu1 %v4260_v2 }
 0x294   :  { %4179 = vmatmul.mubr.msk.f32.gmra.mxu1 %vm752_vm2, %v4935_v48  ;;  %4196 = vmatprep.mubr.msk.f32.mxu0 %vm752_vm2, %v4925_v32  ;;  %v4276_v32 = vld [vmem:[#allocation3 + $0x50] sm:$0xff]  }
 0x295   :  { %3837 = vmatpush3.bf16.msra.mxu1 %v4261_v38  ;;  %3858 = vmatprep.subr.bf16.mxu0 %v4265_v3  ;;  %v5031_v11 = vpop.permute.xlu1 %739 }
 0x296   :  { %3838 = vmatprep.subr.bf16.mxu1 %v4262_v7  ;;  %3859 = vmatpush3.bf16.msra.mxu0 %v4267_v8 }
 0x297   :  { %4197 = vmatmul.mubr.msk.f32.gmra.mxu0 %vm752_vm2, %v4935_v48  ;;  %3860 = vmatprep.subr.bf16.mxu0 %v4269_v4 }
 0x299   :  { %3839 = vmatpush3.bf16.msra.mxu1 %v4263_v9  ;;  %v5039_v43 = vpop.permute.xlu1 %749  ;;  %v735_v9 = vpop.permute.xlu0 %734 }
 0x29a   :  { %3840 = vmatprep.subr.bf16.mxu1 %v4264_v5  ;;  %3861 = vmatpush3.bf16.msra.mxu0 %v4271_v10 }
 0x29b   :  { %3862 = vmatprep.subr.bf16.mxu0 %v4273_v12 }
 0x29d   :  { %3841 = vmatpush3.bf16.msra.mxu1 %v4266_v14  ;;  %v4413_v14 = vmov 1934713408  }
 0x29e   :  { %3842 = vmatprep.subr.bf16.mxu1 %v4268_v16  ;;  %3863 = vmatpush3.bf16.msra.mxu0 %v4275_v17  ;;  %v1544_v16 = vunpack.c.l.s4 %v4413_v14 }
 0x29f   :  { %3864 = vmatprep.subr.bf16.mxu0 %v4277_v18 }
 0x2a1   :  { %3843 = vmatpush3.bf16.msra.mxu1 %v4270_v20 }
 0x2a2   :  { %3844 = vmatprep.subr.bf16.mxu1 %v4272_v24  ;;  %3865 = vmatpush3.bf16.msra.mxu0 %v4279_v25 }
 0x2a3   :  { %3866 = vmatprep.subr.bf16.mxu0 %v4281_v27 }
 0x2a5   :  { %3845 = vmatpush3.bf16.msra.mxu1 %v4274_v28 }
 0x2a6   :  { %3846 = vmatprep.subr.bf16.mxu1 %v4276_v32 }
 0x2a9   :  { %3847 = vmatpush3.bf16.msra.mxu1 %v4278_v34 }
 0x2aa   :  { %3848 = vmatprep.subr.bf16.mxu1 %v4280_v36 }
 0x311   :  { %v5021_v61 = vpop.f32.mrf.mxu1 }
 0x312   :  { %v5089_v39 = vadd.f32 %v5021_v61, %v5031_v11 }
 0x313   :  { %v5023_v6 = vpop.f32.mrf.mxu1 }
 0x314   :  { %v832_v18 = vadd.f32 %v5023_v6, %v735_v9 }
 0x315   :  { %v4072_v58 = vpop.f32.mrf.mxu1 }
 0x316   :  { %v847_v21 = vadd.f32 %v4072_v58, %v5039_v43 }
 0x317   :  { %v5025_v62 = vpop.f32.mrf.mxu1 }
 0x318   :  { %v1448_v30 = vmax.f32 %v847_v21, 0.0 }
 0x31d   :  { %v5027_v0 = vpop.f32.mrf.mxu1 }
 0x31e   :  { %v5105_v61 = vadd.f32 %v5027_v0, %v5031_v11 }
 0x31f   :  { %v5029_v1 = vpop.f32.mrf.mxu1 }
 0x320   :  { %v917_v10 = vadd.f32 %v5029_v1, %v735_v9  ;;  %v1445_v1 = vmax.f32 %v832_v18, 0.0 }
 0x321   :  { %v4090_v63 = vpop.f32.mrf.mxu1 }
 0x322   :  { %v932_v42 = vadd.f32 %v4090_v63, %v5039_v43  ;;  %v1449_v24 = vmax.f32 %v917_v10, 0.0 }
 0x323   :  { %v5033_v13 = vpop.f32.mrf.mxu1 }
 0x324   :  { %v1452_v49 = vmax.f32 %v932_v42, 0.0 }
 0x329   :  { %v5035_v15 = vpop.f32.mrf.mxu1 }
 0x32b   :  { %v5037_v19 = vpop.f32.mrf.mxu1 }
 0x32c   :  { %v1002_v12 = vadd.f32 %v5037_v19, %v735_v9 }
 0x32d   :  { %v4108_v22 = vpop.f32.mrf.mxu1 }
 0x32e   :  { %v1017_v26 = vadd.f32 %v4108_v22, %v5039_v43  ;;  %v1453_v25 = vmax.f32 %v1002_v12, 0.0 }
 0x32f   :  { %v5043_v48 = vpop.f32.mrf.mxu1 }
 0x330   :  { %v1456_v31 = vmax.f32 %v1017_v26, 0.0  ;;  %v1545_v26 = vunpack.c.0.s8 %v1544_v16  ;;  %v1477_v34 = vcombine.low %v1445_v1, %v1453_v25 }
 0x332   :  { %v1885_v33 = vcombine.low %v1448_v30, %v1456_v31  ;;  %v1886_v23 = vcombine.high %v1448_v30, %v1456_v31  ;;  %v5082_v36 = vsub.s32 %v1545_v26, %v1483_v46  ;;  %v1450_v26 = vmax.f32 %v5105_v61, 0.0 }
 0x334   :  { %v5050_v52 = vrot.slane %v1885_v33, %v5047_v50  ;;  %v5053_v54 = vrot.slane %v1886_v23, %v5047_v50 }
 0x335   :  { %v4123_v35 = vpop.f32.mrf.mxu1 }
 0x336   :  { %v5092_v40 = vadd.f32 %v4123_v35, %v5031_v11 }
 0x337   :  { %v1086_v41 = vpop.f32.mrf.mxu1 }
 0x338   :  { %v1087_v4 = vadd.f32 %v1086_v41, %v735_v9  ;;  %v1458_v12 = vmax.f32 %v5092_v40, 0.0 }
 0x33a   :  { %v4126_v44 = vpop.f32.mrf.mxu1  ;;  %v1457_v20 = vmax.f32 %v1087_v4, 0.0  ;;  %v5112_v4 = vrot.slane %v1477_v34, %v5047_v50 }
 0x33b   :  { %v1102_v47 = vadd.f32 %v4126_v44, %v5039_v43 }
 0x33c   :  { %v5061_v57 = vpop.f32.mrf.mxu1  ;;  %v1493_v32 = vcombine.low %v1449_v24, %v1457_v20  ;;  %v1494_v41 = vcombine.high %v1449_v24, %v1457_v20 }
 0x33d   :  { %v1460_v53 = vmax.f32 %v1102_v47, 0.0 }
 0x33e   :  { %v5095_v44 = vrot.slane %v1493_v32, %v5047_v50  ;;  %v5120_v18 = vrot.slane %v1494_v41, %v5047_v50  ;;  %v4288_v32 = vld [vmem:[#allocation3 + $0xc8] sm:$0xff]   ;;  %v4289_v41 = vld [vmem:[#allocation3 + $0x178] sm:$0xff]  }
 0x33f   :  { %v1901_v29 = vcombine.low %v1452_v49, %v1460_v53  ;;  %v1902_v51 = vcombine.high %v1452_v49, %v1460_v53  ;;  %v4282_v49 = vld [vmem:[#allocation3 + $0x8] sm:$0xff]   ;;  %v4283_v53 = vld [vmem:[#allocation3 + $0x98] sm:$0xff]  }
 0x340   :  { %3849 = vmatpush3.bf16.msra.mxu1 %v4282_v49  ;;  %3867 = vmatpush3.bf16.msra.mxu0 %v4283_v53 }
 0x341   :  { %v5056_v55 = vrot.slane %v1901_v29, %v5047_v50  ;;  %v5059_v56 = vrot.slane %v1902_v51, %v5047_v50  ;;  %v4159_v7 = vpop.f32.mrf.mxu0  ;;  %v4284_v29 = vld [vmem:[#allocation3 + $0x40] sm:$0xff]  }
 0x342   :  { %v5098_v45 = vadd.f32 %v4159_v7, %v5031_v11  ;;  %v1478_v7 = vcombine.high %v1445_v1, %v1453_v25  ;;  %3850 = vmatprep.subr.bf16.mxu1 %v4284_v29  ;;  %v4287_v1 = vld [vmem:[#allocation3 + $0x90] sm:$0xff]  }
 0x343   :  { %v1949_v59 = vcombine.low %v5050_v52, %v5056_v55  ;;  %v1950_v60 = vcombine.high %v5050_v52, %v5056_v55  ;;  %v1965_v58 = vcombine.low %v5053_v54, %v5059_v56  ;;  %v1966_v2 = vcombine.high %v5053_v54, %v5059_v56  ;;  %v4141_v38 = vpop.f32.mrf.mxu1  ;;  %v1256_v63 = vpop.f32.mrf.mxu0 }
 0x344   :  { %v1257_v19 = vadd.f32 %v1256_v63, %v735_v9  ;;  %v4285_v63 = vld [vmem:[#allocation3 + $0xd0] sm:$0xff]   ;;  %v5117_v0 = vadd.f32 %v4141_v38, %v5031_v11  ;;  %v1466_v20 = vmax.f32 %v5098_v45, 0.0  ;;  %v1629_v45 = vcombine.low %v1450_v26, %v1458_v12 }
 0x345   :  { %v1171_v3 = vpop.f32.mrf.mxu1  ;;  %v5073_v5 = vpop.f32.mrf.mxu0  ;;  %3868 = vmatprep.subr.bf16.mxu0 %v4285_v63 }
 0x346   :  { %v1172_v28 = vadd.f32 %v1171_v3, %v735_v9  ;;  %v1465_v35 = vmax.f32 %v1257_v19, 0.0  ;;  %v1462_v19 = vmax.f32 %v5117_v0, 0.0  ;;  %3869 = vmatpush3.bf16.msra.mxu0 %v4287_v1  ;;  %v745_v63 = vpop.permute.xlu0 %744 }
 0x347   :  { %v5080_v22 = vpop.f32.mrf.mxu0  ;;  %3870 = vmatprep.subr.bf16.mxu0 %v4288_v32 }
 0x348   :  { %v5071_v8 = vpop.f32.mrf.mxu1  ;;  %v1461_v42 = vmax.f32 %v1172_v28, 0.0  ;;  %v5133_v28 = vrot.slane %v1478_v7, %v5047_v50 }
 0x34a   :  { %v5077_v17 = vpop.f32.mrf.mxu1  ;;  %v1557_v49 = vcombine.low %v5133_v28, %v5120_v18 }
 0x350   :  { %v4177_v21 = vpop.f32.mrf.mxu1 }
 0x351   :  { %v5101_v46 = vadd.f32 %v4177_v21, %v5031_v11 }
 0x352   :  { %v1341_v27 = vpop.f32.mrf.mxu1 }
 0x353   :  { %v1342_v30 = vadd.f32 %v1341_v27, %v735_v9  ;;  %v4195_v31 = vpop.f32.mrf.mxu0  ;;  %v1470_v21 = vmax.f32 %v5101_v46, 0.0 }
 0x354   :  { %v5085_v6 = vadd.f32 %v4195_v31, %v5031_v11  ;;  %v4286_v31 = vld [vmem:[#allocation3] sm:$0xff]  }
 0x355   :  { %v1469_v33 = vmax.f32 %v1342_v30, 0.0  ;;  %v1426_v23 = vpop.f32.mrf.mxu0  ;;  %3851 = vmatpush3.bf16.msra.mxu1 %v4286_v31  ;;  %v1645_v53 = vcombine.low %v1462_v19, %v1470_v21 }
 0x356   :  { %v1427_v37 = vadd.f32 %v1426_v23, %v735_v9  ;;  %v5109_v9 = vadd.f32 %v5035_v15, %v5031_v11  ;;  %v1474_v10 = vmax.f32 %v5085_v6, 0.0  ;;  %v1542_v15 = vcombine.high %v5112_v4, %v5095_v44  ;;  %3880 = vmatprep.subr.bf16.mxu1 %v4289_v41  ;;  %v4296_v41 = vld [vmem:[#allocation3 + $0x1f8] sm:$0xff]  }
 0x357   :  { %v1509_v51 = vcombine.low %v1461_v42, %v1469_v33  ;;  %v1510_v3 = vcombine.high %v1461_v42, %v1469_v33  ;;  %v1446_v42 = vmax.f32 %v5089_v39, 0.0  ;;  %v1630_v6 = vcombine.high %v1450_v26, %v1458_v12 }
 0x358   :  { %v1473_v47 = vmax.f32 %v1427_v37, 0.0  ;;  %v1454_v27 = vmax.f32 %v5109_v9, 0.0  ;;  %v1661_v30 = vcombine.low %v1466_v20, %v1474_v10  ;;  %v5138_v37 = vpop.f32.mrf.mxu0  ;;  %v1556_v29 = vrot.slane %v1542_v15, %v5082_v36 }
 0x359   :  { %v1517_v24 = vrot.slane %v1509_v51, %v5047_v50  ;;  %v1524_v11 = vrot.slane %v1510_v3, %v5047_v50  ;;  %v5154_v51 = vpop.f32.mrf.mxu1  ;;  %v4290_v3 = vld [vmem:[#allocation3 + $0x88] sm:$0xff]   ;;  %v5163_v15 = vadd.f32 %v5025_v62, %v745_v63  ;;  %v1662_v1 = vcombine.high %v1466_v20, %v1474_v10 }
 0x35a   :  { %v1525_v14 = vcombine.low %v1465_v35, %v1473_v47  ;;  %v1526_v16 = vcombine.high %v1465_v35, %v1473_v47  ;;  %v1541_v47 = vcombine.low %v5112_v4, %v5095_v44  ;;  %v1613_v39 = vcombine.low %v1446_v42, %v1454_v27  ;;  %v1436_v9 = vpop.f32.mrf.mxu0  ;;  %3871 = vmatpush3.bf16.msra.mxu0 %v4290_v3 }
 0x35b   :  { %v5152_v35 = vrot.slane %v1661_v30, %v5047_v50  ;;  %v5175_v30 = vrot.slane %v1557_v49, %v5082_v36  ;;  %v1351_v32 = vpop.f32.mrf.mxu1  ;;  %v5195_v20 = vadd.f32 %v5061_v57, %v745_v63  ;;  %v5206_v12 = vadd.f32 %v5043_v48, %v745_v63 }
 0x35c   :  { %v1533_v38 = vrot.slane %v1525_v14, %v5047_v50  ;;  %v1540_v25 = vrot.slane %v1526_v16, %v5047_v50  ;;  %v4292_v16 = vld [vmem:[#allocation3 + $0xc0] sm:$0xff]   ;;  %v5178_v62 = vrot.slane %v1541_v47, %v5082_v36  ;;  %v1621_v31 = vrot.slane %v1613_v39, %v5047_v50 }
 0x35d   :  { %3872 = vmatprep.subr.bf16.mxu0 %v4292_v16  ;;  %v5202_v47 = vadd.f32 %v1351_v32, %v745_v63  ;;  %v5209_v57 = vadd.f32 %v5077_v17, %v745_v63  ;;  %v1644_v48 = vrot.slane %v1630_v6, %v5047_v50 }
 0x35e   :  { %v1573_v33 = vcombine.low %v1517_v24, %v1533_v38  ;;  %v1574_v23 = vcombine.high %v1517_v24, %v1533_v38  ;;  %v1589_v34 = vcombine.low %v1524_v11, %v1540_v25  ;;  %v1590_v44 = vcombine.high %v1524_v11, %v1540_v25 }
 0x35f   :  { %v5166_v24 = vadd.f32 %v5033_v13, %v745_v63  ;;  %v5169_v11 = vrot.slane %v1629_v45, %v5047_v50  ;;  %v1558_v38 = vcombine.high %v5133_v28, %v5120_v18  ;;  %v1653_v25 = vrot.slane %v1645_v53, %v5047_v50  ;;  %v4294_v28 = vld [vmem:[#allocation3 + $0x80] sm:$0xff]  }
 0x360   :  { %v1588_v61 = vrot.slane %v1574_v23, %v5082_v36  ;;  %v5157_v0 = vrot.slane %v1589_v34, %v5082_v36  ;;  %v5160_v14 = vrot.slane %v1573_v33, %v5082_v36  ;;  %v1614_v13 = vcombine.high %v1446_v42, %v1454_v27  ;;  %3873 = vmatpush3.bf16.msra.mxu0 %v4294_v28 }
 0x361   :  { %v5183_v18 = vadd.f32 %v1436_v9, %v745_v63  ;;  %v1709_v33 = vcombine.low %v1653_v25, %v5152_v35  ;;  %v1604_v27 = vrot.slane %v1590_v44, %v5082_v36  ;;  %v1677_v10 = vcombine.low %v1621_v31, %v5169_v11  ;;  %3902 = vmatprep.subr.bf16.mxu0 %v4296_v41 }
 0x362   :  { %v1608_v7 = vcombine.high %v1556_v29, %v1588_v61  ;;  %v1607_v4 = vcombine.low %v1556_v29, %v1588_v61  ;;  %v1609_v23 = vcombine.low %v5175_v30, %v5157_v0  ;;  %v1606_v34 = vcombine.high %v5178_v62, %v5160_v14 }
 0x363   :  { %v5198_v42 = vadd.f32 %v5080_v22, %v745_v63  ;;  %v1646_v45 = vcombine.high %v1462_v19, %v1470_v21  ;;  %v1572_v40 = vrot.slane %v1558_v38, %v5082_v36  ;;  %v1676_v22 = vrot.slane %v1662_v1, %v5047_v50 }
 0x364   :  { %2030 = vrot.lane.b32.xlu1 %v1608_v7, %s4414_s4  ;;  %2026 = vrot.lane.b32.xlu0 %v1607_v4, %s4415_s12  ;;  %v1475_v26 = vmax.f32 %v5183_v18, 0.0  ;;  %v1710_v46 = vcombine.high %v1653_v25, %v5152_v35  ;;  %v1717_v49 = vrot.slane %v1709_v33, %v5082_v36  ;;  %v1451_v53 = vmax.f32 %v5166_v24, 0.0  ;;  %s4442_s4 = smov 68  }
 0x365   :  { %v1612_v21 = vcombine.high %v1572_v40, %v1604_v27  ;;  %v1611_v19 = vcombine.low %v1572_v40, %v1604_v27  ;;  %v1459_v29 = vmax.f32 %v5195_v20, 0.0  ;;  %v1467_v17 = vmax.f32 %v5198_v42, 0.0 }
 0x366   :  { %v1678_v61 = vcombine.high %v1621_v31, %v5169_v11  ;;  %v1660_v39 = vrot.slane %v1646_v45, %v5047_v50  ;;  %v1471_v44 = vmax.f32 %v5202_v47, 0.0  ;;  %v1685_v35 = vrot.slane %v1677_v10, %v5082_v36 }
 0x367   :  { %v1628_v3 = vrot.slane %v1614_v13, %v5047_v50  ;;  %v1455_v63 = vmax.f32 %v5206_v12, 0.0  ;;  %v1463_v9 = vmax.f32 %v5209_v57, 0.0  ;;  %v1797_v7 = vcombine.low %v1467_v17, %v1475_v26 }
 0x368   :  { %2034 = vrot.lane.b32.xlu1 %v1609_v23, %s4416_s13  ;;  %2022 = vrot.lane.b32.xlu0 %v1606_v34, %s4417_s14  ;;  %v1725_v4 = vcombine.low %v1660_v39, %v1676_v22  ;;  %v1741_v16 = vcombine.low %v1685_v35, %v1717_v49  ;;  %v1610_v24 = vcombine.high %v5175_v30, %v5157_v0  ;;  %v1447_v38 = vmax.f32 %v5163_v15, 0.0 }
 0x369   :  { %v1724_v11 = vrot.slane %v1710_v46, %v5082_v36  ;;  %v1693_v25 = vcombine.low %v1628_v3, %v1644_v48  ;;  %v1765_v31 = vcombine.low %v1451_v53, %v1459_v29  ;;  %v1781_v1 = vcombine.low %v1463_v9, %v1471_v44 }
 0x36a   :  { %v1692_v13 = vrot.slane %v1678_v61, %v5082_v36  ;;  %v1605_v32 = vcombine.low %v5178_v62, %v5160_v14  ;;  %v1749_v18 = vcombine.low %v1447_v38, %v1455_v63  ;;  %v1805_v28 = vrot.slane %v1797_v7, %v5047_v50 }
 0x36b   :  { %v1733_v33 = vrot.slane %v1725_v4, %v5082_v36  ;;  %v1726_v15 = vcombine.high %v1660_v39, %v1676_v22  ;;  %v1773_v23 = vrot.slane %v1765_v31, %v5047_v50  ;;  %v1789_v34 = vrot.slane %v1781_v1, %v5047_v50 }
 0x36c   :  { %2046 = vrot.lane.b32.xlu1 %v1612_v21, %s4418_s15  ;;  %2042 = vrot.lane.b32.xlu0 %v1611_v19, %s4419_s16  ;;  %v1744_v0 = vcombine.high %v1692_v13, %v1724_v11  ;;  %v1743_v30 = vcombine.low %v1692_v13, %v1724_v11  ;;  %v1701_v27 = vrot.slane %v1693_v25, %v5082_v36 }
 0x36d   :  { %v1694_v41 = vcombine.high %v1628_v3, %v1644_v48  ;;  %v1757_v6 = vrot.slane %v1749_v18, %v5047_v50  ;;  %v1442_v10 = vadd.f32 %v5138_v37, %v5039_v43  ;;  %v1798_v20 = vcombine.high %v1467_v17, %v1475_v26 }
 0x36e   :  { %v1745_v42 = vcombine.low %v1701_v27, %v1733_v33  ;;  %v1742_v45 = vcombine.high %v1685_v35, %v1717_v49  ;;  %v1740_v47 = vrot.slane %v1726_v15, %v5082_v36  ;;  %v1845_v40 = vcombine.low %v1789_v34, %v1805_v28 }
 0x36f   :  { %v1766_v12 = vcombine.high %v1451_v53, %v1459_v29  ;;  %v1272_v57 = vadd.f32 %v5073_v5, %v5039_v43  ;;  %v1813_v22 = vcombine.low %v1757_v6, %v1773_v23  ;;  %v1357_v46 = vadd.f32 %v5154_v51, %v5039_v43 }
 0x370   :  { %2050 = vrot.lane.b32.xlu1 %v1741_v16, %s4420_s17  ;;  %2038 = vrot.lane.b32.xlu0 %v1610_v24, %s4421_s20  ;;  %v1782_v21 = vcombine.high %v1463_v9, %v1471_v44  ;;  %v1708_v37 = vrot.slane %v1694_v41, %v5082_v36  ;;  %v1750_v26 = vcombine.high %v1447_v38, %v1455_v63  ;;  %v1476_v49 = vmax.f32 %v1442_v10, 0.0 }
 0x371   :  { %v1187_v19 = vadd.f32 %v5071_v8, %v5039_v43  ;;  %v1812_v53 = vrot.slane %v1798_v20, %v5047_v50  ;;  %v1846_v48 = vcombine.high %v1789_v34, %v1805_v28  ;;  %v1853_v17 = vrot.slane %v1845_v40, %v5082_v36 }
 0x372   :  { %v1748_v5 = vcombine.high %v1708_v37, %v1740_v47  ;;  %v1747_v29 = vcombine.low %v1708_v37, %v1740_v47  ;;  %v1780_v51 = vrot.slane %v1766_v12, %v5047_v50  ;;  %v1468_v61 = vmax.f32 %v1272_v57, 0.0 }
 0x373   :  { %v1814_v39 = vcombine.high %v1757_v6, %v1773_v23  ;;  %v1472_v44 = vmax.f32 %v1357_v46, 0.0  ;;  %v1796_v35 = vrot.slane %v1782_v21, %v5047_v50  ;;  %v1821_v43 = vrot.slane %v1813_v22, %v5082_v36 }
 0x374   :  { %2062 = vrot.lane.b32.xlu1 %v1744_v0, %s4422_s21  ;;  %2058 = vrot.lane.b32.xlu0 %v1743_v30, %s4423_s1  ;;  %v1764_v8 = vrot.slane %v1750_v26, %v5047_v50  ;;  %v1464_v3 = vmax.f32 %v1187_v19, 0.0  ;;  %v1933_v63 = vcombine.low %v1468_v61, %v1476_v49  ;;  %v1746_v7 = vcombine.high %v1701_v27, %v1733_v33 }
 0x375   :  { %v1861_v9 = vcombine.low %v1796_v35, %v1812_v53  ;;  %v1877_v4 = vcombine.low %v1821_v43, %v1853_v17  ;;  %v1860_v16 = vrot.slane %v1846_v48, %v5082_v36  ;;  %v1828_v38 = vrot.slane %v1814_v39, %v5082_v36 }
 0x376   :  { %v1829_v24 = vcombine.low %v1764_v8, %v1780_v51  ;;  %v1917_v11 = vcombine.low %v1464_v3, %v1472_v44  ;;  %v1941_v25 = vrot.slane %v1933_v63, %v5047_v50  ;;  %v1862_v31 = vcombine.high %v1796_v35, %v1812_v53  ;;  %v4295_v63 = vld [vmem:[#allocation3 + $0x130] sm:$0xff]  }
 0x377   :  { %v1880_v1 = vcombine.high %v1828_v38, %v1860_v16  ;;  %v1878_v13 = vcombine.high %v1821_v43, %v1853_v17  ;;  %v1869_v18 = vrot.slane %v1861_v9, %v5082_v36  ;;  %v1830_v28 = vcombine.high %v1764_v8, %v1780_v51  ;;  %v4293_v43 = vld [vmem:[#allocation3 + $0x170] sm:$0xff]   ;;  %v4297_v9 = vld [vmem:[#allocation3 + $0x168] sm:$0xff]  }
 0x378   :  { %2066 = vrot.lane.b32.xlu1 %v1745_v42, %s4424_s0  ;;  %2054 = vrot.lane.b32.xlu0 %v1742_v45, %s4425_s9  ;;  %v1925_v0 = vrot.slane %v1917_v11, %v5047_v50  ;;  %v1837_v30 = vrot.slane %v1829_v24, %v5082_v36  ;;  %v1934_v33 = vcombine.high %v1468_v61, %v1476_v49  ;;  %v4298_v11 = vld [vmem:[#allocation3 + $0x128] sm:$0xff]  }
 0x379   :  { %v1879_v23 = vcombine.low %v1828_v38, %v1860_v16  ;;  %v1876_v27 = vrot.slane %v1862_v31, %v5082_v36  ;;  %v1918_v41 = vcombine.high %v1464_v3, %v1472_v44  ;;  %v1844_v6 = vrot.slane %v1830_v28, %v5082_v36  ;;  %v4291_v44 = vld [vmem:[#allocation3 + $0x138] sm:$0xff]   ;;  %v4300_v31 = vld [vmem:[#allocation3 + $0x1f0] sm:$0xff]   ;;  %v4302_v28 = vld [vmem:[#allocation3 + $0x120] sm:$0xff]  }
 0x37a   :  { %v1981_v15 = vcombine.low %v1925_v0, %v1941_v25  ;;  %v1881_v34 = vcombine.low %v1837_v30, %v1869_v18  ;;  %v1948_v10 = vrot.slane %v1934_v33, %v5047_v50  ;;  %v1982_v20 = vcombine.high %v1925_v0, %v1941_v25  ;;  %v4299_v38 = vld [vmem:[#allocation3 + $0x1b8] sm:$0xff]   ;;  %v4303_v0 = vld [vmem:[#allocation3 + $0x1b0] sm:$0xff]  }
 0x37b   :  { %v1884_v45 = vcombine.high %v1844_v6, %v1876_v27  ;;  %v1882_v47 = vcombine.high %v1837_v30, %v1869_v18  ;;  %v1957_v40 = vrot.slane %v1949_v59, %v5082_v36  ;;  %v1932_v12 = vrot.slane %v1918_v41, %v5047_v50  ;;  %v4304_v30 = vld [vmem:[#allocation3 + $0x1e8] sm:$0xff]   ;;  %v4305_v33 = vld [vmem:[#allocation3 + $0x158] sm:$0xff]  }
 0x37c   :  { %2078 = vrot.lane.b32.xlu1 %v1748_v5, %s4408_s19  ;;  %2074 = vrot.lane.b32.xlu0 %v1747_v29, %s4426_s22  ;;  %s4428_s19 = smov 116   ;;  %v1989_v42 = vrot.slane %v1981_v15, %v5082_v36  ;;  %v1996_v57 = vrot.slane %v1982_v20, %v5082_v36  ;;  %v1883_v46 = vcombine.low %v1844_v6, %v1876_v27  ;;  %v4306_v6 = vld [vmem:[#allocation3 + $0x118] sm:$0xff]   ;;  %v4308_v20 = vld [vmem:[#allocation3 + $0x1e0] sm:$0xff]  }
 0x37d   :  { %v1997_v22 = vcombine.low %v1932_v12, %v1948_v10  ;;  %v1964_v37 = vrot.slane %v1950_v60, %v5082_v36  ;;  %v1998_v59 = vcombine.high %v1932_v12, %v1948_v10  ;;  %v1973_v49 = vrot.slane %v1965_v58, %v5082_v36  ;;  %v4307_v10 = vld [vmem:[#allocation3 + $0x1a8] sm:$0xff]   ;;  %v4311_v12 = vld [vmem:[#allocation3 + $0x1a0] sm:$0xff]  }
 0x37e   :  { %v2013_v21 = vcombine.low %v1957_v40, %v1989_v42  ;;  %v2014_v19 = vcombine.high %v1957_v40, %v1989_v42  ;;  %v1980_v53 = vrot.slane %v1966_v2, %v5082_v36  ;;  %v4309_v42 = vld [vmem:[#allocation3 + $0x150] sm:$0xff]  }
 0x37f   :  { %v2005_v50 = vrot.slane %v1997_v22, %v5082_v36  ;;  %v2016_v26 = vcombine.high %v1964_v37, %v1996_v57  ;;  %v2012_v52 = vrot.slane %v1998_v59, %v5082_v36  ;;  %v2015_v55 = vcombine.low %v1964_v37, %v1996_v57  ;;  %v4310_v40 = vld [vmem:[#allocation3 + $0x110] sm:$0xff]   ;;  %v4312_v57 = vld [vmem:[#allocation3 + $0x1d8] sm:$0xff]   ;;  %v4313_v22 = vld [vmem:[#allocation3 + $0x148] sm:$0xff]  }
 0x380   :  { %2070 = vrot.lane.b32.xlu1 %v1746_v7, %s4427_s23  ;;  %2082 = vrot.lane.b32.xlu0 %v1877_v4, %s4407_s18  ;;  %s4430_s18 = smov 56   ;;  %v4314_v37 = vld [vmem:[#allocation3 + $0x108] sm:$0xff]   ;;  %v4315_v59 = vld [vmem:[#allocation3 + $0x198] sm:$0xff]  }
 0x381   :  { %v2017_v60 = vcombine.low %v1973_v49, %v2005_v50  ;;  %v2019_v48 = vcombine.low %v1980_v53, %v2012_v52  ;;  %v2018_v5 = vcombine.high %v1973_v49, %v2005_v50  ;;  %v2020_v58 = vcombine.high %v1980_v53, %v2012_v52 }
 0x384   :  { %2094 = vrot.lane.b32.xlu1 %v1880_v1, %s4428_s19  ;;  %2086 = vrot.lane.b32.xlu0 %v1878_v13, %s4429_s2  ;;  %v4301_v1 = vld [vmem:[#allocation3 + $0x160] sm:$0xff]  }
 0x388   :  { %2090 = vrot.lane.b32.xlu1 %v1879_v23, %s4430_s18  ;;  %2098 = vrot.lane.b32.xlu0 %v1881_v34, %s4431_s24 }
 0x38c   :  { %2110 = vrot.lane.b32.xlu1 %v1884_v45, %s4432_s25  ;;  %2102 = vrot.lane.b32.xlu0 %v1882_v47, %s4433_s26 }
 0x390   :  { %2106 = vrot.lane.b32.xlu1 %v1883_v46, %s4434_s28  ;;  %2114 = vrot.lane.b32.xlu0 %v2013_v21, %s4435_s29 }
 0x394   :  { %2126 = vrot.lane.b32.xlu1 %v2016_v26, %s4436_s5  ;;  %2118 = vrot.lane.b32.xlu0 %v2014_v19, %s4437_s6  ;;  %v4316_v26 = vld [vmem:[#allocation3 + $0x1d0] sm:$0xff]   ;;  %v4317_v19 = vld [vmem:[#allocation3 + $0x140] sm:$0xff]  }
 0x398   :  { %2122 = vrot.lane.b32.xlu1 %v2015_v55, %s4438_s27  ;;  %2130 = vrot.lane.b32.xlu0 %v2017_v60, %s4439_s30 }
 0x39c   :  { %2138 = vrot.lane.b32.xlu1 %v2019_v48, %s4440_s11  ;;  %2134 = vrot.lane.b32.xlu0 %v2018_v5, %s4441_s3  ;;  %v4318_v48 = vld [vmem:[#allocation3 + $0x100] sm:$0xff]   ;;  %v4319_v5 = vld [vmem:[#allocation3 + $0x190] sm:$0xff]  }
 0x3a0   :  { %2142 = vrot.lane.b32.xlu0 %v2020_v58, %s4442_s4 }
 0x3d6   :  { %v2031_v29 = vpop.permute.xlu1 %2030  ;;  %v2027_v17 = vpop.permute.xlu0 %2026 }
 0x3d7   :  { %v2150_v54 = vsel %vm2149_vm3, %v2027_v17, %v2031_v29  ;;  %v4320_v29 = vld [vmem:[#allocation3 + $0x1c8] sm:$0xff]   ;;  %vm2169_vm3 = vcmask 97280  }
 0x3da   :  { %v2035_v56 = vpop.permute.xlu1 %2034  ;;  %v2023_v2 = vpop.permute.xlu0 %2022 }
 0x3db   :  { %v2152_v36 = vsel %vm2151_vm4, %v2150_v54, %v2035_v56  ;;  %v2146_v51 = vsel %vm2145_vm5, %v1605_v32, %v2023_v2  ;;  %vm2183_vm4 = vcmask 883712   ;;  %v4322_v2 = vld [vmem:[#allocation3 + $0x188] sm:$0xff]   ;;  %vm2191_vm5 = vcmask 752640  }
 0x3dc   :  { %v2206_v61 = vpack.c.bf16 %v2152_v36, %v2152_v36  ;;  %v2148_v39 = vsel %vm2147_vm6, %v2146_v51, %v2027_v17  ;;  %v4321_v17 = vld [vmem:[#allocation3 + $0x278] sm:$0xff]   ;;  %vm2178_vm6 = vcmask 457728  }
 0x3dd   :  { %v2205_v35 = vpack.c.bf16 %v2148_v39, %v2148_v39  ;;  %v4323_v36 = vld [vmem:[#allocation3 + $0x238] sm:$0xff]   ;;  %v4325_v39 = vld [vmem:[#allocation3 + $0x270] sm:$0xff]  }
 0x3de   :  { %v2047_v8 = vpop.permute.xlu1 %2046  ;;  %3219 = vmatprep.mubr.bf16.mxu1 %v2206_v61  ;;  %v2043_v3 = vpop.permute.xlu0 %2042  ;;  %v4324_v61 = vld [vmem:[#allocation3 + $0x1c0] sm:$0xff]  }
 0x3df   :  { %3220 = vmatmul.mubr.bf16.vlgmr.msra.gmra.mxu1 %v2205_v35  ;;  %v2158_v7 = vsel %vm2157_vm7, %v2043_v3, %v2047_v8  ;;  %vm2180_vm7 = vcmask 949248  }
 0x3e0   :  { %3881 = vmatpush3.bf16.msra.mxu1 %v4291_v44 }
 0x3e1   :  { %3882 = vmatprep.subr.bf16.mxu1 %v4293_v43 }
 0x3e2   :  { %v5290_v14 = vpop.permute.xlu1 %2050  ;;  %v2039_v62 = vpop.permute.xlu0 %2038 }
 0x3e3   :  { %v2160_v32 = vsel %vm2159_vm8, %v2158_v7, %v5290_v14  ;;  %v2154_v4 = vsel %vm2153_vm9, %v2035_v56, %v2039_v62  ;;  %v4327_v7 = vld [vmem:[#allocation3 + $0x230] sm:$0xff]   ;;  %v4329_v62 = vld [vmem:[#allocation3 + $0x268] sm:$0xff]   ;;  %vm2197_vm8 = vcmask 130048   ;;  %vm2199_vm9 = vcmask 621568  }
 0x3e4   :  { %v2208_v16 = vpack.c.bf16 %v2160_v32, %v2160_v32  ;;  %v2156_v24 = vsel %vm2155_vm10, %v2154_v4, %v2043_v3  ;;  %3883 = vmatpush3.bf16.msra.mxu1 %v4295_v63  ;;  %vm2185_vm10 = vcmask 326656  }
 0x3e5   :  { %v2207_v25 = vpack.c.bf16 %v2156_v24, %v2156_v24  ;;  %3884 = vmatprep.subr.bf16.mxu1 %v4297_v9  ;;  %v4326_v9 = vld [vmem:[#allocation3 + $0x180] sm:$0xff]   ;;  %v4331_v24 = vld [vmem:[#allocation3 + $0x2b8] sm:$0xff]  }
 0x3e6   :  { %v2063_v13 = vpop.permute.xlu1 %2062  ;;  %3259 = vmatprep.mubr.bf16.mxu0 %v2208_v16  ;;  %v5293_v18 = vpop.permute.xlu0 %2058  ;;  %v4330_v16 = vld [vmem:[#allocation3 + $0x228] sm:$0xff]  }
 0x3e7   :  { %3260 = vmatmul.mubr.bf16.vlgmr.msra.gmra.mxu0 %v2207_v25  ;;  %v2166_v15 = vsel %vm2165_vm11, %v5293_v18, %v2063_v13  ;;  %v4332_v25 = vld [vmem:[#allocation3 + $0x2f0] sm:$0xff]   ;;  %vm2187_vm11 = vcmask 818176  }
 0x3e8   :  { %3885 = vmatpush3.bf16.msra.mxu1 %v4298_v11  ;;  %3903 = vmatpush3.bf16.msra.mxu0 %v4299_v38 }
 0x3e9   :  { %3904 = vmatprep.subr.bf16.mxu0 %v4300_v31  ;;  %3886 = vmatprep.subr.bf16.mxu1 %v4301_v1  ;;  %v4333_v31 = vld [vmem:[#allocation3 + $0x260] sm:$0xff]  }
 0x3ea   :  { %v5296_v23 = vpop.permute.xlu1 %2066  ;;  %v2055_v34 = vpop.permute.xlu0 %2054 }
 0x3eb   :  { %v2168_v27 = vsel %vm2167_vm12, %v2166_v15, %v5296_v23  ;;  %v2162_v55 = vsel %vm2161_vm15, %v5290_v14, %v2055_v34  ;;  %v4328_v14 = vld [vmem:[#allocation3 + $0x2f8] sm:$0xff]   ;;  %v4339_v34 = vld [vmem:[#allocation3 + $0x2a8] sm:$0xff]   ;;  %vm4444_vm12 = vmmov 0   ;;  %vm2201_vm15 = vcmask 64512  }
 0x3ec   :  { %v2210_v41 = vpack.c.bf16 %v2168_v27, %v2168_v27  ;;  %3887 = vmatpush3.bf16.msra.mxu1 %v4302_v28  ;;  %3905 = vmatpush3.bf16.msra.mxu0 %v4303_v0  ;;  %v2164_v54 = vsel %vm2163_vm0, %v2162_v55, %v5293_v18  ;;  %v4334_v0 = vld [vmem:[#allocation3 + $0x220] sm:$0xff]   ;;  %v4337_v15 = vld [vmem:[#allocation3 + $0x258] sm:$0xff]   ;;  %vm2203_vm0 = vcmask 556032  }
 0x3ed   :  { %3906 = vmatprep.subr.bf16.mxu0 %v4304_v30  ;;  %3888 = vmatprep.subr.bf16.mxu1 %v4305_v33  ;;  %v2209_v51 = vpack.c.bf16 %v2164_v54, %v2164_v54  ;;  %v4335_v30 = vld [vmem:[#allocation3 + $0x2b0] sm:$0xff]   ;;  %v4336_v33 = vld [vmem:[#allocation3 + $0x2e8] sm:$0xff]   ;;  %v4340_v27 = vld [vmem:[#allocation3 + $0x2e0] sm:$0xff]  }
 0x3ee   :  { %v2079_v45 = vpop.permute.xlu1 %2078  ;;  %v5299_v47 = vpop.permute.xlu0 %2074  ;;  %3299 = vmatprep.mubr.bf16.mxu1 %v2210_v41  ;;  %v4341_v41 = vld [vmem:[#allocation3 + $0x250] sm:$0xff]   ;;  %v4358_v54 = vld [vmem:[#allocation3 + $0x280] sm:$0xff]  }
 0x3ef   :  { %v2174_v50 = vsel %vm2173_vm13, %v5299_v47, %v2079_v45  ;;  %vm2193_vm13 = vcmask 195584  }
 0x3f0   :  { %3889 = vmatpush3.bf16.msra.mxu1 %v4306_v6  ;;  %3907 = vmatpush3.bf16.msra.mxu0 %v4307_v10  ;;  %v4342_v6 = vld [vmem:[#allocation3 + $0x210] sm:$0xff]   ;;  %v4343_v10 = vld [vmem:[#allocation3 + $0x2a0] sm:$0xff]  }
 0x3f1   :  { %3908 = vmatprep.subr.bf16.mxu0 %v4308_v20  ;;  %3890 = vmatprep.subr.bf16.mxu1 %v4309_v42  ;;  %v4344_v20 = vld [vmem:[#allocation3 + $0x248] sm:$0xff]   ;;  %v4345_v42 = vld [vmem:[#allocation3 + $0x2d8] sm:$0xff]  }
 0x3f2   :  { %v2083_v46 = vpop.permute.xlu0 %2082  ;;  %v2071_v21 = vpop.permute.xlu1 %2070 }
 0x3f3   :  { %v2176_v49 = vsel %vm2175_vm14, %v2174_v50, %v2083_v46  ;;  %v2170_v43 = vsel %vm2169_vm3, %v5296_v23, %v2071_v21  ;;  %v4338_v23 = vld [vmem:[#allocation3 + $0x218] sm:$0xff]   ;;  %v4350_v21 = vld [vmem:[#allocation3 + $0x200] sm:$0xff]   ;;  %v4352_v50 = vld [vmem:[#allocation3 + $0x2c8] sm:$0xff]   ;;  %vm2195_vm14 = vcmask 687104   ;;  %vm3532_vm3 = vcmask 7168  }
 0x3f4   :  { %3891 = vmatpush3.bf16.msra.mxu1 %v4310_v40  ;;  %3909 = vmatpush3.bf16.msra.mxu0 %v4311_v12  ;;  %v4346_v40 = vld [vmem:[#allocation3 + $0x208] sm:$0xff]   ;;  %v4347_v12 = vld [vmem:[#allocation3 + $0x298] sm:$0xff]  }
 0x3f5   :  { %3910 = vmatprep.subr.bf16.mxu0 %v4312_v57  ;;  %3892 = vmatprep.subr.bf16.mxu1 %v4313_v22  ;;  %v4348_v57 = vld [vmem:[#allocation3 + $0x240] sm:$0xff]   ;;  %v4349_v22 = vld [vmem:[#allocation3 + $0x2d0] sm:$0xff]  }
 0x3f6   :  { %v5302_v52 = vpop.permute.xlu0 %2086  ;;  %v5307_v58 = vpop.permute.xlu1 %2094 }
 0x3f7   :  { %v2177_v60 = vsel %vm414_vm1, %v2176_v49, %v5302_v52  ;;  %vm2171_vm1 = vcmask 588800  }
 0x3f8   :  { %v2212_v53 = vpack.c.bf16 %v2177_v60, %v2177_v60  ;;  %3893 = vmatpush3.bf16.msra.mxu1 %v4314_v37  ;;  %3911 = vmatpush3.bf16.msra.mxu0 %v4315_v59  ;;  %v2172_v32 = vsel %vm2171_vm1, %v2170_v43, %v5299_v47  ;;  %v4351_v37 = vld [vmem:[#allocation3 + $0x290] sm:$0xff]   ;;  %v4354_v60 = vld [vmem:[#allocation3 + $0x288] sm:$0xff]   ;;  %v4364_v43 = vld [vmem:[#allocation3 + $0x320] sm:$0xff]  }
 0x3f9   :  { %3912 = vmatprep.subr.bf16.mxu0 %v4316_v26  ;;  %3894 = vmatprep.subr.bf16.mxu1 %v4317_v19  ;;  %v2211_v11 = vpack.c.bf16 %v2172_v32, %v2172_v32  ;;  %v4353_v26 = vld [vmem:[#allocation3 + $0x378] sm:$0xff]   ;;  %v4372_v32 = vld [vmem:[#allocation3 + $0x348] sm:$0xff]  }
 0x3fa   :  { %3339 = vmatprep.mubr.bf16.mxu0 %v2212_v53  ;;  %v2099_v56 = vpop.permute.xlu0 %2098  ;;  %v5315_v8 = vpop.permute.xlu1 %2090  ;;  %v4355_v53 = vld [vmem:[#allocation3 + $0x338] sm:$0xff]  }
 0x3fb   :  { %v2182_v44 = vsel %vm752_vm2, %v5307_v58, %v2099_v56  ;;  %vm2189_vm2 = vcmask 261120   ;;  %v2179_v46 = vsel %vm2178_vm6, %v5302_v52, %v5315_v8  ;;  %v4359_v56 = vld [vmem:[#allocation3 + $0x330] sm:$0xff]  }
 0x3fc   :  { %3895 = vmatpush3.bf16.msra.mxu1 %v4318_v48  ;;  %3913 = vmatpush3.bf16.msra.mxu0 %v4319_v5  ;;  %v2181_v19 = vsel %vm2180_vm7, %v2179_v46, %v5307_v58  ;;  %v4356_v5 = vld [vmem:[#allocation3 + $0x2c0] sm:$0xff]   ;;  %v4365_v8 = vld [vmem:[#allocation3 + $0x3b0] sm:$0xff]  }
 0x3fd   :  { %3914 = vmatprep.subr.bf16.mxu0 %v4320_v29  ;;  %3924 = vmatprep.subr.bf16.mxu1 %v4321_v17  ;;  %v2213_v48 = vpack.c.bf16 %v2181_v19, %v2181_v19  ;;  %v4357_v29 = vld [vmem:[#allocation3 + $0x370] sm:$0xff]  }
 0x3fe   :  { %v5312_v35 = vpop.permute.xlu0 %2102  ;;  %v5319_v38 = vpop.permute.xlu1 %2110 }
 0x3ff   :  { %v2184_v3 = vsel %vm2183_vm4, %v2182_v44, %v5312_v35  ;;  %3300 = vmatmul.mubr.bf16.vlgmr.msra.gmra.mxu1 %v2209_v51  ;;  %v4361_v51 = vld [vmem:[#allocation3 + $0x328] sm:$0xff]   ;;  %v4443_v44 = vmov 0.0  }
 0x400   :  { %v2214_v63 = vpack.c.bf16 %v2184_v3, %v2184_v3  ;;  %3915 = vmatpush3.bf16.msra.mxu0 %v4322_v2  ;;  %3925 = vmatpush3.bf16.msra.mxu1 %v4323_v36  ;;  %v4360_v2 = vld [vmem:[#allocation3 + $0x368] sm:$0xff]   ;;  %v4366_v3 = vld [vmem:[#allocation3 + $0x358] sm:$0xff]  }
 0x401   :  { %3916 = vmatprep.subr.bf16.mxu0 %v4324_v61  ;;  %3926 = vmatprep.subr.bf16.mxu1 %v4325_v39  ;;  %v4362_v61 = vld [vmem:[#allocation3 + $0x3b8] sm:$0xff]  }
 0x402   :  { %v2115_v4 = vpop.permute.xlu0 %2114  ;;  %3379 = vmatprep.mubr.bf16.mxu1 %v2214_v63  ;;  %v2107_v47 = vpop.permute.xlu1 %2106  ;;  %v4367_v63 = vld [vmem:[#allocation3 + $0x318] sm:$0xff]  }
 0x403   :  { %v2190_v1 = vsel %vm2189_vm2, %v5319_v38, %v2115_v4  ;;  %v2186_v17 = vsel %vm2185_vm10, %v5312_v35, %v2107_v47  ;;  %v4363_v35 = vld [vmem:[#allocation3 + $0x360] sm:$0xff]  }
 0x404   :  { %3917 = vmatpush3.bf16.msra.mxu0 %v4326_v9  ;;  %3927 = vmatpush3.bf16.msra.mxu1 %v4327_v7  ;;  %v2188_v36 = vsel %vm2187_vm11, %v2186_v17, %v5319_v38  ;;  %v4368_v9 = vld [vmem:[#allocation3 + $0x3a8] sm:$0xff]   ;;  %v4369_v7 = vld [vmem:[#allocation3 + $0x350] sm:$0xff]  }
 0x405   :  { %3946 = vmatprep.subr.bf16.mxu0 %v4328_v14  ;;  %3928 = vmatprep.subr.bf16.mxu1 %v4329_v62  ;;  %v2215_v39 = vpack.c.bf16 %v2188_v36, %v2188_v36  ;;  %v4370_v14 = vld [vmem:[#allocation3 + $0x310] sm:$0xff]   ;;  %v4371_v62 = vld [vmem:[#allocation3 + $0x3a0] sm:$0xff]  }
 0x406   :  { %v5322_v13 = vpop.permute.xlu0 %2118  ;;  %v5330_v49 = vpop.permute.xlu1 %2126 }
 0x407   :  { %3340 = vmatmul.mubr.bf16.vlgmr.msra.gmra.mxu0 %v2211_v11  ;;  %v2192_v18 = vsel %vm2191_vm5, %v2190_v1, %v5322_v13  ;;  %v4375_v11 = vld [vmem:[#allocation3 + $0x340] sm:$0xff]  }
 0x408   :  { %v2216_v28 = vpack.c.bf16 %v2192_v18, %v2192_v18  ;;  %3929 = vmatpush3.bf16.msra.mxu1 %v4330_v16  ;;  %3947 = vmatpush3.bf16.msra.mxu0 %v4331_v24  ;;  %v4373_v16 = vld [vmem:[#allocation3 + $0x308] sm:$0xff]   ;;  %v4374_v24 = vld [vmem:[#allocation3 + $0x398] sm:$0xff]  }
 0x409   :  { %3948 = vmatprep.subr.bf16.mxu0 %v4332_v25  ;;  %3930 = vmatprep.subr.bf16.mxu1 %v4333_v31  ;;  %v4376_v25 = vld [vmem:[#allocation3 + $0x300] sm:$0xff]   ;;  %v4377_v31 = vld [vmem:[#allocation3 + $0x390] sm:$0xff]   ;;  %v4378_v18 = vld [vmem:[#allocation3 + $0x388] sm:$0xff]  }
 0x40a   :  { %3419 = vmatprep.mubr.bf16.mxu0 %v2216_v28  ;;  %v2131_v45 = vpop.permute.xlu0 %2130  ;;  %v2123_v4 = vpop.permute.xlu1 %2122 }
 0x40b   :  { %v2198_v55 = vsel %vm2197_vm8, %v5330_v49, %v2131_v45  ;;  %v2194_v38 = vsel %vm2193_vm13, %v5322_v13, %v2123_v4  ;;  %v4379_v13 = vld [vmem:[#allocation3 + $0x380] sm:$0xff]  }
 0x40c   :  { %3931 = vmatpush3.bf16.msra.mxu1 %v4334_v0  ;;  %3949 = vmatpush3.bf16.msra.mxu0 %v4335_v30  ;;  %v2196_v1 = vsel %vm2195_vm14, %v2194_v38, %v5330_v49 }
 0x40d   :  { %3950 = vmatprep.subr.bf16.mxu0 %v4336_v33  ;;  %3932 = vmatprep.subr.bf16.mxu1 %v4337_v15  ;;  %v2217_v28 = vpack.c.bf16 %v2196_v1, %v2196_v1 }
 0x40e   :  { %v5327_v59 = vpop.permute.xlu0 %2134  ;;  %v2139_v0 = vpop.permute.xlu1 %2138 }
 0x40f   :  { %v2200_v52 = vsel %vm2199_vm9, %v2198_v55, %v5327_v59  ;;  %v2202_v33 = vsel %vm2201_vm15, %v5327_v59, %v2139_v0 }
 0x410   :  { %3933 = vmatpush3.bf16.msra.mxu1 %v4338_v23  ;;  %3951 = vmatpush3.bf16.msra.mxu0 %v4339_v34  ;;  %v2218_v58 = vpack.c.bf16 %v2200_v52, %v2200_v52 }
 0x411   :  { %3952 = vmatprep.subr.bf16.mxu0 %v4340_v27  ;;  %3934 = vmatprep.subr.bf16.mxu1 %v4341_v41 }
 0x412   :  { %v2143_v30 = vpop.permute.xlu0 %2142 }
 0x413   :  { %v2204_v15 = vsel %vm2203_vm0, %v2202_v33, %v2143_v30 }
 0x414   :  { %3935 = vmatpush3.bf16.msra.mxu1 %v4342_v6  ;;  %3953 = vmatpush3.bf16.msra.mxu0 %v4343_v10  ;;  %v2219_v23 = vpack.c.bf16 %v2204_v15, %v2204_v15 }
 0x415   :  { %3936 = vmatprep.subr.bf16.mxu1 %v4344_v20  ;;  %3954 = vmatprep.subr.bf16.mxu0 %v4345_v42  ;;  %v3600_v20 = vld [vmem:[%s5355_s7] ss:$0 sm:$0xff] }
 0x418   :  { %3937 = vmatpush3.bf16.msra.mxu1 %v4346_v40  ;;  %3955 = vmatpush3.bf16.msra.mxu0 %v4347_v12 }
 0x419   :  { %3938 = vmatprep.subr.bf16.mxu1 %v4348_v57  ;;  %3956 = vmatprep.subr.bf16.mxu0 %v4349_v22 }
 0x41c   :  { %3939 = vmatpush3.bf16.msra.mxu1 %v4350_v21  ;;  %3957 = vmatpush3.bf16.msra.mxu0 %v4351_v37 }
 0x41d   :  { %3958 = vmatprep.subr.bf16.mxu0 %v4352_v50  ;;  %3968 = vmatprep.subr.bf16.mxu1 %v4353_v26 }
 0x41f   :  { %3380 = vmatmul.mubr.bf16.vlgmr.msra.gmra.mxu1 %v2213_v48 }
 0x420   :  { %3959 = vmatpush3.bf16.msra.mxu0 %v4354_v60  ;;  %3969 = vmatpush3.bf16.msra.mxu1 %v4355_v53 }
 0x421   :  { %3459 = vmatprep.mubr.bf16.mxu1 %v2218_v58  ;;  %3960 = vmatprep.subr.bf16.mxu0 %v4356_v5 }
 0x422   :  { %3970 = vmatprep.subr.bf16.mxu1 %v4357_v29 }
 0x424   :  { %3961 = vmatpush3.bf16.msra.mxu0 %v4358_v54  ;;  %3971 = vmatpush3.bf16.msra.mxu1 %v4359_v56 }
 0x425   :  { %3972 = vmatprep.subr.bf16.mxu1 %v4360_v2  ;;  %4199 = vmatprep.subr.bf16.mxu0 %v4443_v44 }
 0x427   :  { %3420 = vmatmul.mubr.bf16.vlgmr.msra.gmra.mxu0 %v2215_v39 }
 0x428   :  { %3973 = vmatpush3.bf16.msra.mxu1 %v4361_v51  ;;  %4200 = vmatpush3.bf16.msra.mxu0 %v4362_v61 }
 0x429   :  { %3974 = vmatprep.subr.bf16.mxu1 %v4363_v35  ;;  %4201 = vmatprep.subr.bf16.mxu0 %v4443_v44 }
 0x42a   :  { %4215 = vmatprep.mubr.msk.bf16.mxu0 %vm4444_vm12, %v4443_v44 }
 0x42c   :  { %3975 = vmatpush3.bf16.msra.mxu1 %v4364_v43  ;;  %4202 = vmatpush3.bf16.msra.mxu0 %v4365_v8 }
 0x42d   :  { %3976 = vmatprep.subr.bf16.mxu1 %v4366_v3  ;;  %4203 = vmatprep.subr.bf16.mxu0 %v4443_v44 }
 0x430   :  { %3977 = vmatpush3.bf16.msra.mxu1 %v4367_v63  ;;  %4204 = vmatpush3.bf16.msra.mxu0 %v4368_v9 }
 0x431   :  { %3978 = vmatprep.subr.bf16.mxu1 %v4369_v7  ;;  %4205 = vmatprep.subr.bf16.mxu0 %v4443_v44 }
 0x434   :  { %3979 = vmatpush3.bf16.msra.mxu1 %v4370_v14  ;;  %4206 = vmatpush3.bf16.msra.mxu0 %v4371_v62  ;;  %v3721_v14 = vld [vmem:[%s5356_s8] ss:$0 sm:$0xff] }
 0x435   :  { %3980 = vmatprep.subr.bf16.mxu1 %v4372_v32  ;;  %4207 = vmatprep.subr.bf16.mxu0 %v4443_v44 }
 0x438   :  { %3981 = vmatpush3.bf16.msra.mxu1 %v4373_v16  ;;  %4208 = vmatpush3.bf16.msra.mxu0 %v4374_v24 }
 0x439   :  { %3982 = vmatprep.subr.bf16.mxu1 %v4375_v11  ;;  %4209 = vmatprep.subr.bf16.mxu0 %v4443_v44  ;;  %v3722_v11 = vld [vmem:[#allocation2] ss:$0 sm:$0xff] }
 0x43c   :  { %3983 = vmatpush3.bf16.msra.mxu1 %v4376_v25  ;;  %4210 = vmatpush3.bf16.msra.mxu0 %v4377_v31 }
 0x43d   :  { %4211 = vmatprep.subr.bf16.mxu0 %v4443_v44 }
 0x43f   :  { %3460 = vmatmul.mubr.bf16.vlgmr.msra.gmra.mxu1 %v2217_v28 }
 0x440   :  { %4212 = vmatpush3.bf16.msra.mxu0 %v4378_v18 }
 0x441   :  { %4213 = vmatprep.subr.bf16.mxu0 %v4443_v44 }
 0x444   :  { %4214 = vmatpush3.bf16.msra.mxu0 %v4379_v13 }
 0x447   :  { %4216 = vmatmul.mubr.bf16.vlgmr.msra.gmra.mxu0 %v2219_v23 }
 0x49f   :  { %v3852_v34 = vpop.f32.mrf.mxu1 }
 0x4a1   :  { %v3853_v27 = vpop.f32.mrf.mxu1 }
 0x4a2   :  { %v3854_v41 = vadd.f32 %v3853_v27, %v3852_v34 }
 0x4a3   :  { %v3855_v6 = vpop.f32.mrf.mxu1 }
 0x4a4   :  { %v3222_v47 = vadd.f32 %v3854_v41, %v3600_v20 }
 0x4a5   :  { %v3856_v10 = vpop.f32.mrf.mxu1 }
 0x4a7   :  { %v3874_v42 = vpop.f32.mrf.mxu0 }
 0x4a9   :  { %v3875_v45 = vpop.f32.mrf.mxu0 }
 0x4aa   :  { %v3876_v40 = vadd.f32 %v3875_v45, %v3874_v42 }
 0x4ab   :  { %v3877_v12 = vpop.f32.mrf.mxu0 }
 0x4ac   :  { %v3262_v57 = vadd.f32 %v3876_v40, %v3222_v47 }
 0x4ad   :  { %v3878_v22 = vpop.f32.mrf.mxu0 }
 0x4bf   :  { %v3896_v46 = vpop.f32.mrf.mxu1 }
 0x4c1   :  { %v3897_v21 = vpop.f32.mrf.mxu1 }
 0x4c2   :  { %v3898_v58 = vadd.f32 %v3897_v21, %v3896_v46 }
 0x4c3   :  { %v3899_v37 = vpop.f32.mrf.mxu1 }
 0x4c4   :  { %v3302_v56 = vadd.f32 %v3898_v58, %v3262_v57 }
 0x4c5   :  { %v3900_v59 = vpop.f32.mrf.mxu1 }
 0x4c7   :  { %v3918_v50 = vpop.f32.mrf.mxu0 }
 0x4c9   :  { %v3919_v26 = vpop.f32.mrf.mxu0 }
 0x4ca   :  { %v3920_v54 = vadd.f32 %v3919_v26, %v3918_v50 }
 0x4cb   :  { %v3921_v19 = vpop.f32.mrf.mxu0 }
 0x4cc   :  { %v3342_v51 = vadd.f32 %v3920_v54, %v3302_v56 }
 0x4cd   :  { %v3922_v49 = vpop.f32.mrf.mxu0 }
 0x4df   :  { %v3940_v55 = vpop.f32.mrf.mxu1 }
 0x4e1   :  { %v3941_v52 = vpop.f32.mrf.mxu1 }
 0x4e2   :  { %v3942_v2 = vadd.f32 %v3941_v52, %v3940_v55 }
 0x4e3   :  { %v3943_v60 = vpop.f32.mrf.mxu1 }
 0x4e4   :  { %v3382_v44 = vadd.f32 %v3942_v2, %v3342_v51 }
 0x4e5   :  { %v3944_v53 = vpop.f32.mrf.mxu1 }
 0x4e7   :  { %v3962_v48 = vpop.f32.mrf.mxu0 }
 0x4e9   :  { %v3963_v5 = vpop.f32.mrf.mxu0 }
 0x4ea   :  { %v3964_v61 = vadd.f32 %v3963_v5, %v3962_v48 }
 0x4eb   :  { %v3965_v29 = vpop.f32.mrf.mxu0 }
 0x4ec   :  { %v3422_v8 = vadd.f32 %v3964_v61, %v3382_v44 }
 0x4ed   :  { %v3966_v17 = vpop.f32.mrf.mxu0 }
 0x4ff   :  { %v3984_v36 = vpop.f32.mrf.mxu1 }
 0x501   :  { %v3985_v39 = vpop.f32.mrf.mxu1 }
 0x502   :  { %v3986_v35 = vadd.f32 %v3985_v39, %v3984_v36 }
 0x503   :  { %v3987_v43 = vpop.f32.mrf.mxu1 }
 0x504   :  { %v3462_v63 = vadd.f32 %v3986_v35, %v3422_v8 }
 0x505   :  { %v3988_v3 = vpop.f32.mrf.mxu1 }
 0x507   :  { %v3501_v9 = vpop.f32.mrf.mxu0 }
 0x508   :  { %v3502_v7 = vadd.f32 %v3501_v9, %v3462_v63 }
 0x509   :  { %v4217_v62 = vpop.f32.mrf.mxu0 }
 0x50a   :  { %v3507_v32 = vmax.f32 %v3502_v7, 0.0 }
 0x50b   :  { %v3504_v4 = vpop.f32.mrf.mxu0 }
 0x50c   :  { %v3515_v16 = vmul.f32 %v3721_v14, %v3507_v32 }
 0x50d   :  { %v4218_v24 = vpop.f32.mrf.mxu0 }
 0x50e   :  { %3516 = vadd.xlane.f32.xlu1 %v3515_v16 }
 0x597   :  { %v3517_v38 = vpop.xlane.xlu1 %3516 }
 0x598   :  { %v3525_v25 = vadd.f32 %v3722_v11, %v3517_v38 }
 0x59a   :  { %v3723_v31 = vmul.f32 -1.442695, %v3525_v25 }
 0x59c   :  { %4380 = vpow2.f32 %v3723_v31 }
 0x5a9   :  { %v4381_v1 = vpop.eup %4380 }
 0x5aa   :  { %v3529_v18 = vadd.f32 1.0, %v4381_v1 }
 0x5ac   :  { %4382 = vrcp.f32 %v3529_v18 }
 0x5b9   :  { %v4383_v28 = vpop.eup %4382 }
 0x5ba   :  { %3533 = vst.msk [vmem:[%s5358_s10] sm:$0xff] %vm3532_vm3, %v4383_v28 }
 0x5bb   :  { %3538 = vsyncpa [#allocation4], 1 }

</bundles_post_ra>
